<compile_context>
chip_gen: v7x
topology: tpu7x:2x2x1
jax: 0.10.0
libtpu: 0.0.40
codegen_flags: <defaults>
</compile_context>

<pallas_src>
import functools
import math

import jax
import jax.numpy as jnp
from jax import lax
from jax.experimental import pallas as pl
from jax.experimental.pallas import tpu as pltpu


# ----------------------------------------------------------------------------
# In-kernel helpers (traced inside the kernel)
# ----------------------------------------------------------------------------
def _ln(x, g, b, eps):
    """LayerNorm with f32 statistics; g/b broadcast from (1, H)."""
    mean = jnp.mean(x, axis=-1, keepdims=True)
    cen = x - mean
    var = jnp.mean(cen * cen, axis=-1, keepdims=True)
    return cen * lax.rsqrt(var + eps) * g + b


def _gelu(x):
    # TODO(synk): HF BERT default is erf-GELU; tanh approximation used here
    #             (EUP-friendly, small systematic deviation).
    return 0.5 * x * (1.0 + jnp.tanh(0.7978845608028654 * (x + 0.044715 * x * x * x)))


def _dot_f32(a_bf16, b_bf16):
    """bf16 MXU operands, f32 accumulation."""
    return jnp.dot(a_bf16, b_bf16, preferred_element_type=jnp.float32)


# ----------------------------------------------------------------------------
# Fully fused BERT kernel: grid=(B, L)
#   l==0      : embedding LayerNorm -> resident VMEM activation
#   every l   : QKV + all-heads attention + proj + (res+LN) + FFN + (res+LN)
#   l==L-1    : classifier head on the CLS row (lane-dense padded logits)
# ----------------------------------------------------------------------------
def _bert_kernel(x_ref, m_ref, embg_ref, embb_ref,
                 wqkv_ref, bqkv_ref, wo_ref, bo_ref, ln1g_ref, ln1b_ref,
                 w1_ref, b1_ref, w2_ref, b2_ref, ln2g_ref, ln2b_ref,
                 cw1_ref, cb1_ref, cw2_ref, cb2_ref,
                 logits_ref, x_vmem,
                 *, heads, scale, eps):
    l = pl.program_id(1)
    n_layers = pl.num_programs(1)

    # --- l == 0: fused embedding LayerNorm; activation lives in VMEM scratch -
    @pl.when(l == 0)
    def _():
        x_vmem[...] = _ln(x_ref[0], embg_ref[...], embb_ref[...], eps)

    x = x_vmem[...]                       # (S, H) f32, resident across layers
    mask = m_ref[0]                       # (1, S) additive bias, f32
    S, H = x.shape
    Dh = H // heads

    # --- fused QKV projection: one [S,H] x [H,3H] matmul (bf16 weights) -----
    qkv = _dot_f32(x.astype(jnp.bfloat16), wqkv_ref[...]) + bqkv_ref[...]
    qkv_b = qkv.astype(jnp.bfloat16)      # single cast for all heads' operands

    qs = [qkv_b[:, h * Dh:(h + 1) * Dh] for h in range(heads)]
    ks = [qkv_b[:, H + h * Dh:H + (h + 1) * Dh] for h in range(heads)]
    vs = [qkv_b[:, 2 * H + h * Dh:2 * H + (h + 1) * Dh] for h in range(heads)]

    # all score matmuls first (grouped MXU pushes, no k transpose on the XLU)
    scores = [lax.dot_general(qs[h], ks[h], (((1,), (1,)), ((), ())),
                              preferred_element_type=jnp.float32) * scale + mask
              for h in range(heads)]
    # softmax in f32 on VPU/EUP (v5e has no bf16 VPU/EUP)
    probs = []
    for s in scores:
        s = s - jnp.max(s, axis=-1, keepdims=True)
        p = jnp.exp(s)
        probs.append(p * pl.reciprocal(jnp.sum(p, axis=-1, keepdims=True),
                                       approx=True))
    # all PV matmuls (grouped MXU pushes)
    ctx = [_dot_f32(probs[h].astype(jnp.bfloat16), vs[h]) for h in range(heads)]

    # lane-dense in-register head merge: no Dh-wide masked stores, no scratch
    attn = jnp.concatenate(ctx, axis=-1).astype(jnp.bfloat16)    # (S, H)
    a = _dot_f32(attn, wo_ref[...]) + bo_ref[...]

    # --- residual + LayerNorm 1 (f32 statistics) -----------------------------
    y = _ln(x + a, ln1g_ref[...], ln1b_ref[...], eps)

    # --- FFN: (S, I) intermediate never leaves VMEM --------------------------
    # TODO(synk): at BERT-base width (S=512, I=3072) tile this over S rows to
    #             bound peak VMEM on v7x; unnecessary at these shapes.
    f = _gelu(_dot_f32(y.astype(jnp.bfloat16), w1_ref[...]) + b1_ref[...])
    f = _dot_f32(f.astype(jnp.bfloat16), w2_ref[...]) + b2_ref[...]

    # --- residual + LayerNorm 2 -> new resident activation -------------------
    new_x = _ln(y + f, ln2g_ref[...], ln2b_ref[...], eps)
    x_vmem[...] = new_x

    # --- last layer: fused classifier head on the CLS row --------------------
    @pl.when(l == n_layers - 1)
    def _():
        cls = new_x[0:1, :]                                       # (1, H) f32
        h1 = _dot_f32(cls.astype(jnp.bfloat16), cw1_ref[...]) + cb1_ref[...]
        h1 = jnp.maximum(h1, 0.0)
        # TODO(synk): nn.Dropout(0.3) is identity at inference; not applied.
        logits = _dot_f32(h1.astype(jnp.bfloat16), cw2_ref[...]) + cb2_ref[...]
        logits_ref[0] = jnp.broadcast_to(logits, (8, logits.shape[-1]))


# ----------------------------------------------------------------------------
# Parameters (deterministic init; scaled-down BERT encoder)
# ----------------------------------------------------------------------------
CFG = dict(
    vocab=128, max_pos=32, type_vocab=2,
    hidden=128, heads=4, layers=2, intermediate=256,
    cls_hidden=128, num_classes=4,
)
_CP = 128   # classifier output padded to 128 lanes (sliced back in the wrapper)


def init_params(key, cfg):
    H, I, L = cfg["hidden"], cfg["intermediate"], cfg["layers"]
    CH, C = cfg["cls_hidden"], cfg["num_classes"]
    bf = jnp.bfloat16

    def nrm(k, shape, std=0.02, dtype=jnp.float32):
        return (std * jax.random.normal(k, shape, dtype=jnp.float32)).astype(dtype)

    keys = iter(jax.random.split(key, 32))
    p = {
        "word_emb": nrm(next(keys), (cfg["vocab"], H)),
        "pos_emb": nrm(next(keys), (cfg["max_pos"], H)),
        "type_emb": nrm(next(keys), (cfg["type_vocab"], H)),
        "emb_ln_g": jnp.ones((1, H), jnp.float32),
        "emb_ln_b": jnp.zeros((1, H), jnp.float32),
        # per-layer params stacked along a leading L axis (grid=(B, L));
        # big matrices stored bf16 (half the DMA bytes / VMEM), the rest f32.
        # NOTE: wqkv concatenates Q|K|V in exactly the order the kernel slices.
        "wqkv": nrm(next(keys), (L, H, 3 * H), dtype=bf),
        "bqkv": jnp.zeros((L, 1, 3 * H), jnp.float32),
        "wo": nrm(next(keys), (L, H, H), dtype=bf),
        "bo": jnp.zeros((L, 1, H), jnp.float32),
        "ln1_g": jnp.ones((L, 1, H), jnp.float32),
        "ln1_b": jnp.zeros((L, 1, H), jnp.float32),
        "w1": nrm(next(keys), (L, H, I), dtype=bf),
        "b1": jnp.zeros((L, 1, I), jnp.float32),
        "w2": nrm(next(keys), (L, I, H), dtype=bf),
        "b2": jnp.zeros((L, 1, H), jnp.float32),
        "ln2_g": jnp.ones((L, 1, H), jnp.float32),
        "ln2_b": jnp.zeros((L, 1, H), jnp.float32),
        # classifier head; num_classes padded to 128 lanes for lane-dense stores
        "cls_w1": nrm(next(keys), (H, CH), dtype=bf),
        "cls_b1": jnp.zeros((1, CH), jnp.float32),
        "cls_w2": jnp.zeros((CH, _CP), bf).at[:, :C].set(
            nrm(next(keys), (CH, C), dtype=bf)),
        "cls_b2": jnp.zeros((1, _CP), jnp.float32),
    }
    return p


# ----------------------------------------------------------------------------
# Forward pass: embedding gathers are XLA glue, everything else is one kernel
# ----------------------------------------------------------------------------
def transformer_symptom_classifier(params, input_ids, attention_mask, cfg=CFG):
    B, S = input_ids.shape
    H, heads, C = cfg["hidden"], cfg["heads"], cfg["num_classes"]
    L = params["wqkv"].shape[0]
    I = params["w1"].shape[2]
    CH = params["cls_w1"].shape[1]
    Cp = params["cls_w2"].shape[1]

    # --- embeddings (gather left to XLA; token_type_ids == 0) ---------------
    emb = (params["word_emb"][input_ids]
           + params["pos_emb"][:S][None, :, :]
           + params["type_emb"][0][None, None, :])                 # (B, S, H)
    # additive attention-mask bias, (B, 1, S), f32
    mask_bias = ((1.0 - attention_mask.astype(jnp.float32)) * -1e9)[:, None, :]

    scale = 1.0 / math.sqrt(H // heads)
    kern = functools.partial(_bert_kernel, heads=heads, scale=scale, eps=1e-12)

    per_batch3 = lambda b, l: (b, 0, 0)      # x / mask / logits: follow b only
    per_layer3 = lambda b, l: (l, 0, 0)      # stacked layer params: follow l
    const2 = lambda b, l: (0, 0)             # emb-LN + classifier params

    logits_padded = pl.pallas_call(
        kern,
        out_shape=jax.ShapeDtypeStruct((B, 8, Cp), jnp.float32),
        grid=(B, L),
        in_specs=[
            pl.BlockSpec((1, S, H), per_batch3),        # embeddings (pre-LN)
            pl.BlockSpec((1, 1, S), per_batch3),        # additive mask bias
            pl.BlockSpec((1, H), const2),               # emb LN gamma
            pl.BlockSpec((1, H), const2),               # emb LN beta
            pl.BlockSpec((None, H, 3 * H), per_layer3),  # wqkv (bf16, fused q|k|v)
            pl.BlockSpec((None, 1, 3 * H), per_layer3),  # bqkv
            pl.BlockSpec((None, H, H), per_layer3),      # wo (bf16)
            pl.BlockSpec((None, 1, H), per_layer3),      # bo
            pl.BlockSpec((None, 1, H), per_layer3),      # ln1 gamma
            pl.BlockSpec((None, 1, H), per_layer3),      # ln1 beta
            pl.BlockSpec((None, H, I), per_layer3),      # ffn w1 (bf16)
            pl.BlockSpec((None, 1, I), per_layer3),      # ffn b1
            pl.BlockSpec((None, I, H), per_layer3),      # ffn w2 (bf16)
            pl.BlockSpec((None, 1, H), per_layer3),      # ffn b2
            pl.BlockSpec((None, 1, H), per_layer3),      # ln2 gamma
            pl.BlockSpec((None, 1, H), per_layer3),      # ln2 beta
            pl.BlockSpec((H, CH), const2),               # cls w1 (bf16)
            pl.BlockSpec((1, CH), const2),               # cls b1
            pl.BlockSpec((CH, Cp), const2),              # cls w2 (bf16, padded)
            pl.BlockSpec((1, Cp), const2),               # cls b2 (padded)
        ],
        out_specs=pl.BlockSpec((1, 8, Cp), per_batch3),  # lane-dense padded logits
        scratch_shapes=[pltpu.VMEM((S, H), jnp.float32)],  # resident activation
        compiler_params=pltpu.CompilerParams(
            dimension_semantics=("parallel", "arbitrary"),
            vmem_limit_bytes=48 * 1024 * 1024),
    )(emb, mask_bias,
      params["emb_ln_g"], params["emb_ln_b"],
      params["wqkv"], params["bqkv"], params["wo"], params["bo"],
      params["ln1_g"], params["ln1_b"],
      params["w1"], params["b1"], params["w2"], params["b2"],
      params["ln2_g"], params["ln2_b"],
      params["cls_w1"], params["cls_b1"], params["cls_w2"], params["cls_b2"])

    return logits_padded[:, 0, :C]


# ----------------------------------------------------------------------------
if __name__ == "__main__":
    key = jax.random.PRNGKey(0)
    pkey, ikey = jax.random.split(key)

    params = init_params(pkey, CFG)

    B, S = 2, 8
    input_ids = jax.random.randint(ikey, (B, S), 0, CFG["vocab"], dtype=jnp.int32)
    attention_mask = jnp.ones((B, S), dtype=jnp.int32)

    logits = jax.jit(transformer_symptom_classifier)(params, input_ids, attention_mask)
    logits = jax.block_until_ready(logits)
    assert logits.shape == (B, CFG["num_classes"])
    assert bool(jnp.all(jnp.isfinite(logits)))
    print("KERNEL_OK")
</pallas_src>

<mosaic_0001>
module attributes {stable_mosaic.version = 11 : i64} {
  func.func @_bert_kernel(%arg0: i32, %arg1: i32, %arg2: memref<1x8x128xf32, #tpu.memory_space<vmem>>, %arg3: memref<1x1x8xf32, #tpu.memory_space<vmem>>, %arg4: memref<1x128xf32, #tpu.memory_space<vmem>>, %arg5: memref<1x128xf32, #tpu.memory_space<vmem>>, %arg6: memref<1x128x384xbf16, #tpu.memory_space<vmem>>, %arg7: memref<1x1x384xf32, #tpu.memory_space<vmem>>, %arg8: memref<1x128x128xbf16, #tpu.memory_space<vmem>>, %arg9: memref<1x1x128xf32, #tpu.memory_space<vmem>>, %arg10: memref<1x1x128xf32, #tpu.memory_space<vmem>>, %arg11: memref<1x1x128xf32, #tpu.memory_space<vmem>>, %arg12: memref<1x128x256xbf16, #tpu.memory_space<vmem>>, %arg13: memref<1x1x256xf32, #tpu.memory_space<vmem>>, %arg14: memref<1x256x128xbf16, #tpu.memory_space<vmem>>, %arg15: memref<1x1x128xf32, #tpu.memory_space<vmem>>, %arg16: memref<1x1x128xf32, #tpu.memory_space<vmem>>, %arg17: memref<1x1x128xf32, #tpu.memory_space<vmem>>, %arg18: memref<128x128xbf16, #tpu.memory_space<vmem>>, %arg19: memref<1x128xf32, #tpu.memory_space<vmem>>, %arg20: memref<128x128xbf16, #tpu.memory_space<vmem>>, %arg21: memref<1x128xf32, #tpu.memory_space<vmem>>, %arg22: memref<1x8x128xf32, #tpu.memory_space<vmem>>, %arg23: memref<8x128xf32, #tpu.memory_space<vmem>>) attributes {dimension_semantics = [#tpu.dimension_semantics<parallel>, #tpu.dimension_semantics<arbitrary>], iteration_bounds = array<i64: 2, 2>, scalar_prefetch = 0 : i64, scratch_operands = 1 : i64, tpu.core_type = #tpu.core_type<tc>, window_params = [{transform_indices = @transform_0, window_bounds = array<i64: 1, 8, 128>}, {transform_indices = @transform_1, window_bounds = array<i64: 1, 1, 8>}, {pipeline_mode = #tpu.pipeline_mode<synchronous>, transform_indices = @transform_2, window_bounds = array<i64: 1, 128>}, {pipeline_mode = #tpu.pipeline_mode<synchronous>, transform_indices = @transform_3, window_bounds = array<i64: 1, 128>}, {transform_indices = @transform_4, window_bounds = array<i64: 1, 128, 384>}, {transform_indices = @transform_5, window_bounds = array<i64: 1, 1, 384>}, {transform_indices = @transform_6, window_bounds = array<i64: 1, 128, 128>}, {transform_indices = @transform_7, window_bounds = array<i64: 1, 1, 128>}, {transform_indices = @transform_8, window_bounds = array<i64: 1, 1, 128>}, {transform_indices = @transform_9, window_bounds = array<i64: 1, 1, 128>}, {transform_indices = @transform_10, window_bounds = array<i64: 1, 128, 256>}, {transform_indices = @transform_11, window_bounds = array<i64: 1, 1, 256>}, {transform_indices = @transform_12, window_bounds = array<i64: 1, 256, 128>}, {transform_indices = @transform_13, window_bounds = array<i64: 1, 1, 128>}, {transform_indices = @transform_14, window_bounds = array<i64: 1, 1, 128>}, {transform_indices = @transform_15, window_bounds = array<i64: 1, 1, 128>}, {pipeline_mode = #tpu.pipeline_mode<synchronous>, transform_indices = @transform_16, window_bounds = array<i64: 128, 128>}, {pipeline_mode = #tpu.pipeline_mode<synchronous>, transform_indices = @transform_17, window_bounds = array<i64: 1, 128>}, {pipeline_mode = #tpu.pipeline_mode<synchronous>, transform_indices = @transform_18, window_bounds = array<i64: 128, 128>}, {pipeline_mode = #tpu.pipeline_mode<synchronous>, transform_indices = @transform_19, window_bounds = array<i64: 1, 128>}, {transform_indices = @transform_20, window_bounds = array<i64: 1, 8, 128>}]} {
    %c0_i32 = arith.constant 0 : i32
    %0 = arith.cmpi eq, %arg1, %c0_i32 : i32
    %1 = arith.extui %0 : i1 to i32
    %c0_i32_0 = arith.constant 0 : i32
    %2 = arith.cmpi ne, %1, %c0_i32_0 : i32
    scf.if %2 {
      %c0_81 = arith.constant 0 : index
      %c0_82 = arith.constant 0 : index
      %c0_83 = arith.constant 0 : index
      %187 = vector.load %arg2[%c0_81, %c0_82, %c0_83] : memref<1x8x128xf32, #tpu.memory_space<vmem>>, vector<1x8x128xf32>
      %188 = vector.shape_cast %187 : vector<1x8x128xf32> to vector<8x128xf32>
      %c0_84 = arith.constant 0 : index
      %c0_85 = arith.constant 0 : index
      %189 = vector.load %arg4[%c0_84, %c0_85] : memref<1x128xf32, #tpu.memory_space<vmem>>, vector<1x128xf32>
      %c0_86 = arith.constant 0 : index
      %c0_87 = arith.constant 0 : index
      %190 = vector.load %arg5[%c0_86, %c0_87] : memref<1x128xf32, #tpu.memory_space<vmem>>, vector<1x128xf32>
      %cst_88 = arith.constant dense<0.000000e+00> : vector<8xf32>
      %191 = vector.multi_reduction <add>, %188, %cst_88 [1] : vector<8x128xf32> to vector<8xf32>
      %192 = vector.shape_cast %191 : vector<8xf32> to vector<8x1xf32>
      %cst_89 = arith.constant 1.280000e+02 : f32
      %193 = vector.broadcast %cst_89 : f32 to vector<8x1xf32>
      %194 = arith.divf %192, %193 : vector<8x1xf32>
      %195 = vector.broadcast %194 : vector<8x1xf32> to vector<8x128xf32>
      %196 = arith.subf %188, %195 : vector<8x128xf32>
      %197 = arith.mulf %196, %196 : vector<8x128xf32>
      %cst_90 = arith.constant dense<0.000000e+00> : vector<8xf32>
      %198 = vector.multi_reduction <add>, %197, %cst_90 [1] : vector<8x128xf32> to vector<8xf32>
      %199 = vector.shape_cast %198 : vector<8xf32> to vector<8x1xf32>
      %cst_91 = arith.constant 1.280000e+02 : f32
      %200 = vector.broadcast %cst_91 : f32 to vector<8x1xf32>
      %201 = arith.divf %199, %200 : vector<8x1xf32>
      %cst_92 = arith.constant 9.99999996E-13 : f32
      %202 = vector.broadcast %cst_92 : f32 to vector<8x1xf32>
      %203 = arith.addf %201, %202 : vector<8x1xf32>
      %204 = math.rsqrt %203 : vector<8x1xf32>
      %205 = vector.broadcast %204 : vector<8x1xf32> to vector<8x128xf32>
      %206 = arith.mulf %196, %205 : vector<8x128xf32>
      %207 = vector.broadcast %189 : vector<1x128xf32> to vector<8x128xf32>
      %208 = arith.mulf %206, %207 : vector<8x128xf32>
      %209 = vector.broadcast %190 : vector<1x128xf32> to vector<8x128xf32>
      %210 = arith.addf %208, %209 : vector<8x128xf32>
      %c0_93 = arith.constant 0 : index
      %c0_94 = arith.constant 0 : index
      %211 = vector.load %arg23[%c0_93, %c0_94] : memref<8x128xf32, #tpu.memory_space<vmem>>, vector<8x128xf32>
      tpu.vector_store %arg23[%c0_93, %c0_94], %210 {strides = array<i32>} : memref<8x128xf32, #tpu.memory_space<vmem>>, vector<8x128xf32>,
    } else {
    }
    %c0 = arith.constant 0 : index
    %c0_1 = arith.constant 0 : index
    %3 = vector.load %arg23[%c0, %c0_1] : memref<8x128xf32, #tpu.memory_space<vmem>>, vector<8x128xf32>
    %c0_2 = arith.constant 0 : index
    %c0_3 = arith.constant 0 : index
    %c0_4 = arith.constant 0 : index
    %4 = vector.load %arg3[%c0_2, %c0_3, %c0_4] : memref<1x1x8xf32, #tpu.memory_space<vmem>>, vector<1x1x8xf32>
    %5 = vector.shape_cast %4 : vector<1x1x8xf32> to vector<1x8xf32>
    %6 = arith.truncf %3 : vector<8x128xf32> to vector<8x128xbf16>
    %c0_5 = arith.constant 0 : index
    %c0_6 = arith.constant 0 : index
    %c0_7 = arith.constant 0 : index
    %7 = vector.load %arg6[%c0_5, %c0_6, %c0_7] : memref<1x128x384xbf16, #tpu.memory_space<vmem>>, vector<1x128x384xbf16>
    %8 = vector.shape_cast %7 : vector<1x128x384xbf16> to vector<128x384xbf16>
    %cst = arith.constant dense<0.000000e+00> : vector<8x384xf32>
    %9 = tpu.matmul %6, %8, %cst {dimension_numbers = #tpu.dot_dimension_numbers<[1], [0], [0], [1], [0, 0, 1, 1], [], []>} : vector<8x128xbf16>, vector<128x384xbf16>, vector<8x384xf32> -> vector<8x384xf32>
    %c0_8 = arith.constant 0 : index
    %c0_9 = arith.constant 0 : index
    %c0_10 = arith.constant 0 : index
    %10 = vector.load %arg7[%c0_8, %c0_9, %c0_10] : memref<1x1x384xf32, #tpu.memory_space<vmem>>, vector<1x1x384xf32>
    %11 = vector.shape_cast %10 : vector<1x1x384xf32> to vector<1x384xf32>
    %12 = vector.broadcast %11 : vector<1x384xf32> to vector<8x384xf32>
    %13 = arith.addf %9, %12 : vector<8x384xf32>
    %14 = arith.truncf %13 : vector<8x384xf32> to vector<8x384xbf16>
    %15 = vector.extract_strided_slice %14 {offsets = [0, 0], sizes = [8, 32], strides = [1, 1]} : vector<8x384xbf16> to vector<8x32xbf16>
    %16 = vector.extract_strided_slice %14 {offsets = [0, 32], sizes = [8, 32], strides = [1, 1]} : vector<8x384xbf16> to vector<8x32xbf16>
    %17 = vector.extract_strided_slice %14 {offsets = [0, 64], sizes = [8, 32], strides = [1, 1]} : vector<8x384xbf16> to vector<8x32xbf16>
    %18 = vector.extract_strided_slice %14 {offsets = [0, 96], sizes = [8, 32], strides = [1, 1]} : vector<8x384xbf16> to vector<8x32xbf16>
    %19 = vector.extract_strided_slice %14 {offsets = [0, 128], sizes = [8, 32], strides = [1, 1]} : vector<8x384xbf16> to vector<8x32xbf16>
    %20 = vector.extract_strided_slice %14 {offsets = [0, 160], sizes = [8, 32], strides = [1, 1]} : vector<8x384xbf16> to vector<8x32xbf16>
    %21 = vector.extract_strided_slice %14 {offsets = [0, 192], sizes = [8, 32], strides = [1, 1]} : vector<8x384xbf16> to vector<8x32xbf16>
    %22 = vector.extract_strided_slice %14 {offsets = [0, 224], sizes = [8, 32], strides = [1, 1]} : vector<8x384xbf16> to vector<8x32xbf16>
    %23 = vector.extract_strided_slice %14 {offsets = [0, 256], sizes = [8, 32], strides = [1, 1]} : vector<8x384xbf16> to vector<8x32xbf16>
    %24 = vector.extract_strided_slice %14 {offsets = [0, 288], sizes = [8, 32], strides = [1, 1]} : vector<8x384xbf16> to vector<8x32xbf16>
    %25 = vector.extract_strided_slice %14 {offsets = [0, 320], sizes = [8, 32], strides = [1, 1]} : vector<8x384xbf16> to vector<8x32xbf16>
    %26 = vector.extract_strided_slice %14 {offsets = [0, 352], sizes = [8, 32], strides = [1, 1]} : vector<8x384xbf16> to vector<8x32xbf16>
    %cst_11 = arith.constant dense<0.000000e+00> : vector<8x8xf32>
    %27 = tpu.matmul %15, %19, %cst_11 {dimension_numbers = #tpu.dot_dimension_numbers<[1], [1], [0], [0], [0, 0, 1, 0], [], []>} : vector<8x32xbf16>, vector<8x32xbf16>, vector<8x8xf32> -> vector<8x8xf32>
    %cst_12 = arith.constant 0.176776692 : f32
    %28 = vector.broadcast %cst_12 : f32 to vector<8x8xf32>
    %29 = arith.mulf %27, %28 : vector<8x8xf32>
    %30 = vector.broadcast %5 : vector<1x8xf32> to vector<8x8xf32>
    %31 = arith.addf %29, %30 : vector<8x8xf32>
    %cst_13 = arith.constant dense<0.000000e+00> : vector<8x8xf32>
    %32 = tpu.matmul %16, %20, %cst_13 {dimension_numbers = #tpu.dot_dimension_numbers<[1], [1], [0], [0], [0, 0, 1, 0], [], []>} : vector<8x32xbf16>, vector<8x32xbf16>, vector<8x8xf32> -> vector<8x8xf32>
    %cst_14 = arith.constant 0.176776692 : f32
    %33 = vector.broadcast %cst_14 : f32 to vector<8x8xf32>
    %34 = arith.mulf %32, %33 : vector<8x8xf32>
    %35 = vector.broadcast %5 : vector<1x8xf32> to vector<8x8xf32>
    %36 = arith.addf %34, %35 : vector<8x8xf32>
    %cst_15 = arith.constant dense<0.000000e+00> : vector<8x8xf32>
    %37 = tpu.matmul %17, %21, %cst_15 {dimension_numbers = #tpu.dot_dimension_numbers<[1], [1], [0], [0], [0, 0, 1, 0], [], []>} : vector<8x32xbf16>, vector<8x32xbf16>, vector<8x8xf32> -> vector<8x8xf32>
    %cst_16 = arith.constant 0.176776692 : f32
    %38 = vector.broadcast %cst_16 : f32 to vector<8x8xf32>
    %39 = arith.mulf %37, %38 : vector<8x8xf32>
    %40 = vector.broadcast %5 : vector<1x8xf32> to vector<8x8xf32>
    %41 = arith.addf %39, %40 : vector<8x8xf32>
    %cst_17 = arith.constant dense<0.000000e+00> : vector<8x8xf32>
    %42 = tpu.matmul %18, %22, %cst_17 {dimension_numbers = #tpu.dot_dimension_numbers<[1], [1], [0], [0], [0, 0, 1, 0], [], []>} : vector<8x32xbf16>, vector<8x32xbf16>, vector<8x8xf32> -> vector<8x8xf32>
    %cst_18 = arith.constant 0.176776692 : f32
    %43 = vector.broadcast %cst_18 : f32 to vector<8x8xf32>
    %44 = arith.mulf %42, %43 : vector<8x8xf32>
    %45 = vector.broadcast %5 : vector<1x8xf32> to vector<8x8xf32>
    %46 = arith.addf %44, %45 : vector<8x8xf32>
    %cst_19 = arith.constant dense<0xFF800000> : vector<8xf32>
    %47 = vector.multi_reduction <maximumf>, %31, %cst_19 [1] : vector<8x8xf32> to vector<8xf32>
    %48 = vector.shape_cast %47 : vector<8xf32> to vector<8x1xf32>
    %49 = vector.broadcast %48 : vector<8x1xf32> to vector<8x8xf32>
    %50 = arith.subf %31, %49 : vector<8x8xf32>
    %51 = math.exp %50 : vector<8x8xf32>
    %cst_20 = arith.constant dense<0.000000e+00> : vector<8xf32>
    %52 = vector.multi_reduction <add>, %51, %cst_20 [1] : vector<8x8xf32> to vector<8xf32>
    %53 = vector.shape_cast %52 : vector<8xf32> to vector<8x1xf32>
    %54 = tpu.reciprocal %53 {approx = true} : vector<8x1xf32> -> vector<8x1xf32>
    %55 = vector.broadcast %54 : vector<8x1xf32> to vector<8x8xf32>
    %56 = arith.mulf %51, %55 : vector<8x8xf32>
    %cst_21 = arith.constant dense<0xFF800000> : vector<8xf32>
    %57 = vector.multi_reduction <maximumf>, %36, %cst_21 [1] : vector<8x8xf32> to vector<8xf32>
    %58 = vector.shape_cast %57 : vector<8xf32> to vector<8x1xf32>
    %59 = vector.broadcast %58 : vector<8x1xf32> to vector<8x8xf32>
    %60 = arith.subf %36, %59 : vector<8x8xf32>
    %61 = math.exp %60 : vector<8x8xf32>
    %cst_22 = arith.constant dense<0.000000e+00> : vector<8xf32>
    %62 = vector.multi_reduction <add>, %61, %cst_22 [1] : vector<8x8xf32> to vector<8xf32>
    %63 = vector.shape_cast %62 : vector<8xf32> to vector<8x1xf32>
    %64 = tpu.reciprocal %63 {approx = true} : vector<8x1xf32> -> vector<8x1xf32>
    %65 = vector.broadcast %64 : vector<8x1xf32> to vector<8x8xf32>
    %66 = arith.mulf %61, %65 : vector<8x8xf32>
    %cst_23 = arith.constant dense<0xFF800000> : vector<8xf32>
    %67 = vector.multi_reduction <maximumf>, %41, %cst_23 [1] : vector<8x8xf32> to vector<8xf32>
    %68 = vector.shape_cast %67 : vector<8xf32> to vector<8x1xf32>
    %69 = vector.broadcast %68 : vector<8x1xf32> to vector<8x8xf32>
    %70 = arith.subf %41, %69 : vector<8x8xf32>
    %71 = math.exp %70 : vector<8x8xf32>
    %cst_24 = arith.constant dense<0.000000e+00> : vector<8xf32>
    %72 = vector.multi_reduction <add>, %71, %cst_24 [1] : vector<8x8xf32> to vector<8xf32>
    %73 = vector.shape_cast %72 : vector<8xf32> to vector<8x1xf32>
    %74 = tpu.reciprocal %73 {approx = true} : vector<8x1xf32> -> vector<8x1xf32>
    %75 = vector.broadcast %74 : vector<8x1xf32> to vector<8x8xf32>
    %76 = arith.mulf %71, %75 : vector<8x8xf32>
    %cst_25 = arith.constant dense<0xFF800000> : vector<8xf32>
    %77 = vector.multi_reduction <maximumf>, %46, %cst_25 [1] : vector<8x8xf32> to vector<8xf32>
    %78 = vector.shape_cast %77 : vector<8xf32> to vector<8x1xf32>
    %79 = vector.broadcast %78 : vector<8x1xf32> to vector<8x8xf32>
    %80 = arith.subf %46, %79 : vector<8x8xf32>
    %81 = math.exp %80 : vector<8x8xf32>
    %cst_26 = arith.constant dense<0.000000e+00> : vector<8xf32>
    %82 = vector.multi_reduction <add>, %81, %cst_26 [1] : vector<8x8xf32> to vector<8xf32>
    %83 = vector.shape_cast %82 : vector<8xf32> to vector<8x1xf32>
    %84 = tpu.reciprocal %83 {approx = true} : vector<8x1xf32> -> vector<8x1xf32>
    %85 = vector.broadcast %84 : vector<8x1xf32> to vector<8x8xf32>
    %86 = arith.mulf %81, %85 : vector<8x8xf32>
    %87 = arith.truncf %56 : vector<8x8xf32> to vector<8x8xbf16>
    %cst_27 = arith.constant dense<0.000000e+00> : vector<8x32xf32>
    %88 = tpu.matmul %87, %23, %cst_27 {dimension_numbers = #tpu.dot_dimension_numbers<[1], [0], [0], [1], [0, 0, 1, 1], [], []>} : vector<8x8xbf16>, vector<8x32xbf16>, vector<8x32xf32> -> vector<8x32xf32>
    %89 = arith.truncf %66 : vector<8x8xf32> to vector<8x8xbf16>
    %cst_28 = arith.constant dense<0.000000e+00> : vector<8x32xf32>
    %90 = tpu.matmul %89, %24, %cst_28 {dimension_numbers = #tpu.dot_dimension_numbers<[1], [0], [0], [1], [0, 0, 1, 1], [], []>} : vector<8x8xbf16>, vector<8x32xbf16>, vector<8x32xf32> -> vector<8x32xf32>
    %91 = arith.truncf %76 : vector<8x8xf32> to vector<8x8xbf16>
    %cst_29 = arith.constant dense<0.000000e+00> : vector<8x32xf32>
    %92 = tpu.matmul %91, %25, %cst_29 {dimension_numbers = #tpu.dot_dimension_numbers<[1], [0], [0], [1], [0, 0, 1, 1], [], []>} : vector<8x8xbf16>, vector<8x32xbf16>, vector<8x32xf32> -> vector<8x32xf32>
    %93 = arith.truncf %86 : vector<8x8xf32> to vector<8x8xbf16>
    %cst_30 = arith.constant dense<0.000000e+00> : vector<8x32xf32>
    %94 = tpu.matmul %93, %26, %cst_30 {dimension_numbers = #tpu.dot_dimension_numbers<[1], [0], [0], [1], [0, 0, 1, 1], [], []>} : vector<8x8xbf16>, vector<8x32xbf16>, vector<8x32xf32> -> vector<8x32xf32>
    %95 = tpu.concatenate %88, %90, %92, %94 in 1 : vector<8x32xf32>, vector<8x32xf32>, vector<8x32xf32>, vector<8x32xf32> -> vector<8x128xf32>
    %96 = arith.truncf %95 : vector<8x128xf32> to vector<8x128xbf16>
    %c0_31 = arith.constant 0 : index
    %c0_32 = arith.constant 0 : index
    %c0_33 = arith.constant 0 : index
    %97 = vector.load %arg8[%c0_31, %c0_32, %c0_33] : memref<1x128x128xbf16, #tpu.memory_space<vmem>>, vector<1x128x128xbf16>
    %98 = vector.shape_cast %97 : vector<1x128x128xbf16> to vector<128x128xbf16>
    %cst_34 = arith.constant dense<0.000000e+00> : vector<8x128xf32>
    %99 = tpu.matmul %96, %98, %cst_34 {dimension_numbers = #tpu.dot_dimension_numbers<[1], [0], [0], [1], [0, 0, 1, 1], [], []>} : vector<8x128xbf16>, vector<128x128xbf16>, vector<8x128xf32> -> vector<8x128xf32>
    %c0_35 = arith.constant 0 : index
    %c0_36 = arith.constant 0 : index
    %c0_37 = arith.constant 0 : index
    %100 = vector.load %arg9[%c0_35, %c0_36, %c0_37] : memref<1x1x128xf32, #tpu.memory_space<vmem>>, vector<1x1x128xf32>
    %101 = vector.shape_cast %100 : vector<1x1x128xf32> to vector<1x128xf32>
    %102 = vector.broadcast %101 : vector<1x128xf32> to vector<8x128xf32>
    %103 = arith.addf %99, %102 : vector<8x128xf32>
    %104 = arith.addf %3, %103 : vector<8x128xf32>
    %c0_38 = arith.constant 0 : index
    %c0_39 = arith.constant 0 : index
    %c0_40 = arith.constant 0 : index
    %105 = vector.load %arg10[%c0_38, %c0_39, %c0_40] : memref<1x1x128xf32, #tpu.memory_space<vmem>>, vector<1x1x128xf32>
    %106 = vector.shape_cast %105 : vector<1x1x128xf32> to vector<1x128xf32>
    %c0_41 = arith.constant 0 : index
    %c0_42 = arith.constant 0 : index
    %c0_43 = arith.constant 0 : index
    %107 = vector.load %arg11[%c0_41, %c0_42, %c0_43] : memref<1x1x128xf32, #tpu.memory_space<vmem>>, vector<1x1x128xf32>
    %108 = vector.shape_cast %107 : vector<1x1x128xf32> to vector<1x128xf32>
    %cst_44 = arith.constant dense<0.000000e+00> : vector<8xf32>
    %109 = vector.multi_reduction <add>, %104, %cst_44 [1] : vector<8x128xf32> to vector<8xf32>
    %110 = vector.shape_cast %109 : vector<8xf32> to vector<8x1xf32>
    %cst_45 = arith.constant 1.280000e+02 : f32
    %111 = vector.broadcast %cst_45 : f32 to vector<8x1xf32>
    %112 = arith.divf %110, %111 : vector<8x1xf32>
    %113 = vector.broadcast %112 : vector<8x1xf32> to vector<8x128xf32>
    %114 = arith.subf %104, %113 : vector<8x128xf32>
    %115 = arith.mulf %114, %114 : vector<8x128xf32>
    %cst_46 = arith.constant dense<0.000000e+00> : vector<8xf32>
    %116 = vector.multi_reduction <add>, %115, %cst_46 [1] : vector<8x128xf32> to vector<8xf32>
    %117 = vector.shape_cast %116 : vector<8xf32> to vector<8x1xf32>
    %cst_47 = arith.constant 1.280000e+02 : f32
    %118 = vector.broadcast %cst_47 : f32 to vector<8x1xf32>
    %119 = arith.divf %117, %118 : vector<8x1xf32>
    %cst_48 = arith.constant 9.99999996E-13 : f32
    %120 = vector.broadcast %cst_48 : f32 to vector<8x1xf32>
    %121 = arith.addf %119, %120 : vector<8x1xf32>
    %122 = math.rsqrt %121 : vector<8x1xf32>
    %123 = vector.broadcast %122 : vector<8x1xf32> to vector<8x128xf32>
    %124 = arith.mulf %114, %123 : vector<8x128xf32>
    %125 = vector.broadcast %106 : vector<1x128xf32> to vector<8x128xf32>
    %126 = arith.mulf %124, %125 : vector<8x128xf32>
    %127 = vector.broadcast %108 : vector<1x128xf32> to vector<8x128xf32>
    %128 = arith.addf %126, %127 : vector<8x128xf32>
    %129 = arith.truncf %128 : vector<8x128xf32> to vector<8x128xbf16>
    %c0_49 = arith.constant 0 : index
    %c0_50 = arith.constant 0 : index
    %c0_51 = arith.constant 0 : index
    %130 = vector.load %arg12[%c0_49, %c0_50, %c0_51] : memref<1x128x256xbf16, #tpu.memory_space<vmem>>, vector<1x128x256xbf16>
    %131 = vector.shape_cast %130 : vector<1x128x256xbf16> to vector<128x256xbf16>
    %cst_52 = arith.constant dense<0.000000e+00> : vector<8x256xf32>
    %132 = tpu.matmul %129, %131, %cst_52 {dimension_numbers = #tpu.dot_dimension_numbers<[1], [0], [0], [1], [0, 0, 1, 1], [], []>} : vector<8x128xbf16>, vector<128x256xbf16>, vector<8x256xf32> -> vector<8x256xf32>
    %c0_53 = arith.constant 0 : index
    %c0_54 = arith.constant 0 : index
    %c0_55 = arith.constant 0 : index
    %133 = vector.load %arg13[%c0_53, %c0_54, %c0_55] : memref<1x1x256xf32, #tpu.memory_space<vmem>>, vector<1x1x256xf32>
    %134 = vector.shape_cast %133 : vector<1x1x256xf32> to vector<1x256xf32>
    %135 = vector.broadcast %134 : vector<1x256xf32> to vector<8x256xf32>
    %136 = arith.addf %132, %135 : vector<8x256xf32>
    %cst_56 = arith.constant 5.000000e-01 : f32
    %137 = vector.broadcast %cst_56 : f32 to vector<8x256xf32>
    %138 = arith.mulf %137, %136 : vector<8x256xf32>
    %cst_57 = arith.constant 4.471500e-02 : f32
    %139 = vector.broadcast %cst_57 : f32 to vector<8x256xf32>
    %140 = arith.mulf %139, %136 : vector<8x256xf32>
    %141 = arith.mulf %140, %136 : vector<8x256xf32>
    %142 = arith.mulf %141, %136 : vector<8x256xf32>
    %143 = arith.addf %136, %142 : vector<8x256xf32>
    %cst_58 = arith.constant 0.797884583 : f32
    %144 = vector.broadcast %cst_58 : f32 to vector<8x256xf32>
    %145 = arith.mulf %144, %143 : vector<8x256xf32>
    %146 = math.tanh %145 : vector<8x256xf32>
    %cst_59 = arith.constant 1.000000e+00 : f32
    %147 = vector.broadcast %cst_59 : f32 to vector<8x256xf32>
    %148 = arith.addf %147, %146 : vector<8x256xf32>
    %149 = arith.mulf %138, %148 : vector<8x256xf32>
    %150 = arith.truncf %149 : vector<8x256xf32> to vector<8x256xbf16>
    %c0_60 = arith.constant 0 : index
    %c0_61 = arith.constant 0 : index
    %c0_62 = arith.constant 0 : index
    %151 = vector.load %arg14[%c0_60, %c0_61, %c0_62] : memref<1x256x128xbf16, #tpu.memory_space<vmem>>, vector<1x256x128xbf16>
    %152 = vector.shape_cast %151 : vector<1x256x128xbf16> to vector<256x128xbf16>
    %cst_63 = arith.constant dense<0.000000e+00> : vector<8x128xf32>
    %153 = tpu.matmul %150, %152, %cst_63 {dimension_numbers = #tpu.dot_dimension_numbers<[1], [0], [0], [1], [0, 0, 1, 1], [], []>} : vector<8x256xbf16>, vector<256x128xbf16>, vector<8x128xf32> -> vector<8x128xf32>
    %c0_64 = arith.constant 0 : index
    %c0_65 = arith.constant 0 : index
    %c0_66 = arith.constant 0 : index
    %154 = vector.load %arg15[%c0_64, %c0_65, %c0_66] : memref<1x1x128xf32, #tpu.memory_space<vmem>>, vector<1x1x128xf32>
    %155 = vector.shape_cast %154 : vector<1x1x128xf32> to vector<1x128xf32>
    %156 = vector.broadcast %155 : vector<1x128xf32> to vector<8x128xf32>
    %157 = arith.addf %153, %156 : vector<8x128xf32>
    %158 = arith.addf %128, %157 : vector<8x128xf32>
    %c0_67 = arith.constant 0 : index
    %c0_68 = arith.constant 0 : index
    %c0_69 = arith.constant 0 : index
    %159 = vector.load %arg16[%c0_67, %c0_68, %c0_69] : memref<1x1x128xf32, #tpu.memory_space<vmem>>, vector<1x1x128xf32>
    %160 = vector.shape_cast %159 : vector<1x1x128xf32> to vector<1x128xf32>
    %c0_70 = arith.constant 0 : index
    %c0_71 = arith.constant 0 : index
    %c0_72 = arith.constant 0 : index
    %161 = vector.load %arg17[%c0_70, %c0_71, %c0_72] : memref<1x1x128xf32, #tpu.memory_space<vmem>>, vector<1x1x128xf32>
    %162 = vector.shape_cast %161 : vector<1x1x128xf32> to vector<1x128xf32>
    %cst_73 = arith.constant dense<0.000000e+00> : vector<8xf32>
    %163 = vector.multi_reduction <add>, %158, %cst_73 [1] : vector<8x128xf32> to vector<8xf32>
    %164 = vector.shape_cast %163 : vector<8xf32> to vector<8x1xf32>
    %cst_74 = arith.constant 1.280000e+02 : f32
    %165 = vector.broadcast %cst_74 : f32 to vector<8x1xf32>
    %166 = arith.divf %164, %165 : vector<8x1xf32>
    %167 = vector.broadcast %166 : vector<8x1xf32> to vector<8x128xf32>
    %168 = arith.subf %158, %167 : vector<8x128xf32>
    %169 = arith.mulf %168, %168 : vector<8x128xf32>
    %cst_75 = arith.constant dense<0.000000e+00> : vector<8xf32>
    %170 = vector.multi_reduction <add>, %169, %cst_75 [1] : vector<8x128xf32> to vector<8xf32>
    %171 = vector.shape_cast %170 : vector<8xf32> to vector<8x1xf32>
    %cst_76 = arith.constant 1.280000e+02 : f32
    %172 = vector.broadcast %cst_76 : f32 to vector<8x1xf32>
    %173 = arith.divf %171, %172 : vector<8x1xf32>
    %cst_77 = arith.constant 9.99999996E-13 : f32
    %174 = vector.broadcast %cst_77 : f32 to vector<8x1xf32>
    %175 = arith.addf %173, %174 : vector<8x1xf32>
    %176 = math.rsqrt %175 : vector<8x1xf32>
    %177 = vector.broadcast %176 : vector<8x1xf32> to vector<8x128xf32>
    %178 = arith.mulf %168, %177 : vector<8x128xf32>
    %179 = vector.broadcast %160 : vector<1x128xf32> to vector<8x128xf32>
    %180 = arith.mulf %178, %179 : vector<8x128xf32>
    %181 = vector.broadcast %162 : vector<1x128xf32> to vector<8x128xf32>
    %182 = arith.addf %180, %181 : vector<8x128xf32>
    %c0_78 = arith.constant 0 : index
    %c0_79 = arith.constant 0 : index
    %183 = vector.load %arg23[%c0_78, %c0_79] : memref<8x128xf32, #tpu.memory_space<vmem>>, vector<8x128xf32>
    tpu.vector_store %arg23[%c0_78, %c0_79], %182 {strides = array<i32>} : memref<8x128xf32, #tpu.memory_space<vmem>>, vector<8x128xf32>,
    %c1_i32 = arith.constant 1 : i32
    %184 = arith.cmpi eq, %arg1, %c1_i32 : i32
    %185 = arith.extui %184 : i1 to i32
    %c0_i32_80 = arith.constant 0 : i32
    %186 = arith.cmpi ne, %185, %c0_i32_80 : i32
    scf.if %186 {
      %187 = vector.extract_strided_slice %182 {offsets = [0, 0], sizes = [1, 128], strides = [1, 1]} : vector<8x128xf32> to vector<1x128xf32>
      %188 = arith.truncf %187 : vector<1x128xf32> to vector<1x128xbf16>
      %c0_81 = arith.constant 0 : index
      %c0_82 = arith.constant 0 : index
      %189 = vector.load %arg18[%c0_81, %c0_82] : memref<128x128xbf16, #tpu.memory_space<vmem>>, vector<128x128xbf16>
      %cst_83 = arith.constant dense<0.000000e+00> : vector<1x128xf32>
      %190 = tpu.matmul %188, %189, %cst_83 {dimension_numbers = #tpu.dot_dimension_numbers<[1], [0], [0], [1], [0, 0, 1, 1], [], []>} : vector<1x128xbf16>, vector<128x128xbf16>, vector<1x128xf32> -> vector<1x128xf32>
      %c0_84 = arith.constant 0 : index
      %c0_85 = arith.constant 0 : index
      %191 = vector.load %arg19[%c0_84, %c0_85] : memref<1x128xf32, #tpu.memory_space<vmem>>, vector<1x128xf32>
      %192 = arith.addf %190, %191 : vector<1x128xf32>
      %cst_86 = arith.constant 0.000000e+00 : f32
      %193 = vector.broadcast %cst_86 : f32 to vector<1x128xf32>
      %194 = arith.maximumf %192, %193 : vector<1x128xf32>
      %195 = arith.truncf %194 : vector<1x128xf32> to vector<1x128xbf16>
      %c0_87 = arith.constant 0 : index
      %c0_88 = arith.constant 0 : index
      %196 = vector.load %arg20[%c0_87, %c0_88] : memref<128x128xbf16, #tpu.memory_space<vmem>>, vector<128x128xbf16>
      %cst_89 = arith.constant dense<0.000000e+00> : vector<1x128xf32>
      %197 = tpu.matmul %195, %196, %cst_89 {dimension_numbers = #tpu.dot_dimension_numbers<[1], [0], [0], [1], [0, 0, 1, 1], [], []>} : vector<1x128xbf16>, vector<128x128xbf16>, vector<1x128xf32> -> vector<1x128xf32>
      %c0_90 = arith.constant 0 : index
      %c0_91 = arith.constant 0 : index
      %198 = vector.load %arg21[%c0_90, %c0_91] : memref<1x128xf32, #tpu.memory_space<vmem>>, vector<1x128xf32>
      %199 = arith.addf %197, %198 : vector<1x128xf32>
      %200 = vector.shape_cast %199 : vector<1x128xf32> to vector<1x128xf32>
      %201 = vector.broadcast %200 : vector<1x128xf32> to vector<8x128xf32>
      %c0_92 = arith.constant 0 : index
      %c0_93 = arith.constant 0 : index
      %c0_94 = arith.constant 0 : index
      %202 = vector.load %arg22[%c0_92, %c0_93, %c0_94] : memref<1x8x128xf32, #tpu.memory_space<vmem>>, vector<1x8x128xf32>
      %203 = vector.shape_cast %202 : vector<1x8x128xf32> to vector<8x128xf32>
      %204 = vector.shape_cast %201 : vector<8x128xf32> to vector<1x8x128xf32>
      tpu.vector_store %arg22[%c0_92, %c0_93, %c0_94], %204 {strides = array<i32>} : memref<1x8x128xf32, #tpu.memory_space<vmem>>, vector<1x8x128xf32>,
    } else {
    }
    return
  }
  func.func @transform_0(%arg0: i32, %arg1: i32) -> (i32, i32, i32) {
    %c0_i32 = arith.constant 0 : i32
    %c0_i32_0 = arith.constant 0 : i32
    %c0_i32_1 = arith.constant 0 : i32
    return %arg0, %c0_i32, %c0_i32_0 : i32, i32, i32
  }
  func.func @transform_1(%arg0: i32, %arg1: i32) -> (i32, i32, i32) {
    %c0_i32 = arith.constant 0 : i32
    %c0_i32_0 = arith.constant 0 : i32
    %c0_i32_1 = arith.constant 0 : i32
    return %arg0, %c0_i32, %c0_i32_0 : i32, i32, i32
  }
  func.func @transform_2(%arg0: i32, %arg1: i32) -> (i32, i32) {
    %c0_i32 = arith.constant 0 : i32
    %c0_i32_0 = arith.constant 0 : i32
    %c0_i32_1 = arith.constant 0 : i32
    return %c0_i32, %c0_i32_0 : i32, i32
  }
  func.func @transform_3(%arg0: i32, %arg1: i32) -> (i32, i32) {
    %c0_i32 = arith.constant 0 : i32
    %c0_i32_0 = arith.constant 0 : i32
    %c0_i32_1 = arith.constant 0 : i32
    return %c0_i32, %c0_i32_0 : i32, i32
  }
  func.func @transform_4(%arg0: i32, %arg1: i32) -> (i32, i32, i32) {
    %c0_i32 = arith.constant 0 : i32
    %c0_i32_0 = arith.constant 0 : i32
    %c0_i32_1 = arith.constant 0 : i32
    return %arg1, %c0_i32, %c0_i32_0 : i32, i32, i32
  }
  func.func @transform_5(%arg0: i32, %arg1: i32) -> (i32, i32, i32) {
    %c0_i32 = arith.constant 0 : i32
    %c0_i32_0 = arith.constant 0 : i32
    %c0_i32_1 = arith.constant 0 : i32
    return %arg1, %c0_i32, %c0_i32_0 : i32, i32, i32
  }
  func.func @transform_6(%arg0: i32, %arg1: i32) -> (i32, i32, i32) {
    %c0_i32 = arith.constant 0 : i32
    %c0_i32_0 = arith.constant 0 : i32
    %c0_i32_1 = arith.constant 0 : i32
    return %arg1, %c0_i32, %c0_i32_0 : i32, i32, i32
  }
  func.func @transform_7(%arg0: i32, %arg1: i32) -> (i32, i32, i32) {
    %c0_i32 = arith.constant 0 : i32
    %c0_i32_0 = arith.constant 0 : i32
    %c0_i32_1 = arith.constant 0 : i32
    return %arg1, %c0_i32, %c0_i32_0 : i32, i32, i32
  }
  func.func @transform_8(%arg0: i32, %arg1: i32) -> (i32, i32, i32) {
    %c0_i32 = arith.constant 0 : i32
    %c0_i32_0 = arith.constant 0 : i32
    %c0_i32_1 = arith.constant 0 : i32
    return %arg1, %c0_i32, %c0_i32_0 : i32, i32, i32
  }
  func.func @transform_9(%arg0: i32, %arg1: i32) -> (i32, i32, i32) {
    %c0_i32 = arith.constant 0 : i32
    %c0_i32_0 = arith.constant 0 : i32
    %c0_i32_1 = arith.constant 0 : i32
    return %arg1, %c0_i32, %c0_i32_0 : i32, i32, i32
  }
  func.func @transform_10(%arg0: i32, %arg1: i32) -> (i32, i32, i32) {
    %c0_i32 = arith.constant 0 : i32
    %c0_i32_0 = arith.constant 0 : i32
    %c0_i32_1 = arith.constant 0 : i32
    return %arg1, %c0_i32, %c0_i32_0 : i32, i32, i32
  }
  func.func @transform_11(%arg0: i32, %arg1: i32) -> (i32, i32, i32) {
    %c0_i32 = arith.constant 0 : i32
    %c0_i32_0 = arith.constant 0 : i32
    %c0_i32_1 = arith.constant 0 : i32
    return %arg1, %c0_i32, %c0_i32_0 : i32, i32, i32
  }
  func.func @transform_12(%arg0: i32, %arg1: i32) -> (i32, i32, i32) {
    %c0_i32 = arith.constant 0 : i32
    %c0_i32_0 = arith.constant 0 : i32
    %c0_i32_1 = arith.constant 0 : i32
    return %arg1, %c0_i32, %c0_i32_0 : i32, i32, i32
  }
  func.func @transform_13(%arg0: i32, %arg1: i32) -> (i32, i32, i32) {
    %c0_i32 = arith.constant 0 : i32
    %c0_i32_0 = arith.constant 0 : i32
    %c0_i32_1 = arith.constant 0 : i32
    return %arg1, %c0_i32, %c0_i32_0 : i32, i32, i32
  }
  func.func @transform_14(%arg0: i32, %arg1: i32) -> (i32, i32, i32) {
    %c0_i32 = arith.constant 0 : i32
    %c0_i32_0 = arith.constant 0 : i32
    %c0_i32_1 = arith.constant 0 : i32
    return %arg1, %c0_i32, %c0_i32_0 : i32, i32, i32
  }
  func.func @transform_15(%arg0: i32, %arg1: i32) -> (i32, i32, i32) {
    %c0_i32 = arith.constant 0 : i32
    %c0_i32_0 = arith.constant 0 : i32
    %c0_i32_1 = arith.constant 0 : i32
    return %arg1, %c0_i32, %c0_i32_0 : i32, i32, i32
  }
  func.func @transform_16(%arg0: i32, %arg1: i32) -> (i32, i32) {
    %c0_i32 = arith.constant 0 : i32
    %c0_i32_0 = arith.constant 0 : i32
    %c0_i32_1 = arith.constant 0 : i32
    return %c0_i32, %c0_i32_0 : i32, i32
  }
  func.func @transform_17(%arg0: i32, %arg1: i32) -> (i32, i32) {
    %c0_i32 = arith.constant 0 : i32
    %c0_i32_0 = arith.constant 0 : i32
    %c0_i32_1 = arith.constant 0 : i32
    return %c0_i32, %c0_i32_0 : i32, i32
  }
  func.func @transform_18(%arg0: i32, %arg1: i32) -> (i32, i32) {
    %c0_i32 = arith.constant 0 : i32
    %c0_i32_0 = arith.constant 0 : i32
    %c0_i32_1 = arith.constant 0 : i32
    return %c0_i32, %c0_i32_0 : i32, i32
  }
  func.func @transform_19(%arg0: i32, %arg1: i32) -> (i32, i32) {
    %c0_i32 = arith.constant 0 : i32
    %c0_i32_0 = arith.constant 0 : i32
    %c0_i32_1 = arith.constant 0 : i32
    return %c0_i32, %c0_i32_0 : i32, i32
  }
  func.func @transform_20(%arg0: i32, %arg1: i32) -> (i32, i32, i32) {
    %c0_i32 = arith.constant 0 : i32
    %c0_i32_0 = arith.constant 0 : i32
    %c0_i32_1 = arith.constant 0 : i32
    return %arg0, %c0_i32, %c0_i32_0 : i32, i32, i32
  }
}

</mosaic_0001>

<bundles_post_ra>
// kernel: transformer_symptom_classifier.1
= control target key start
LH: loop header
LB: loop body
LE: loop exit
PB: predicated region body
PF: predicated region fallthrough
CT: control target
= control target key end

     0   :  { %s4715_s0 = inlined_call_operand.vmem [shape: f32[2,8,128], index: 0, kind: input, shape index: {}]   ;;  %s4716_s1 = inlined_call_operand.vmem [shape: f32[2,1,8], index: 1, kind: input, shape index: {}]   ;;  %s4717_s2 = inlined_call_operand.hbm [shape: f32[1,128], index: 2, kind: input, shape index: {}]   ;;  %s4718_s3 = inlined_call_operand.hbm [shape: f32[1,128], index: 3, kind: input, shape index: {}]   ;;  %s4719_s4 = inlined_call_operand.hbm [shape: bf16[2,128,384], index: 4, kind: input, shape index: {}]   ;;  %s4720_s5 = inlined_call_operand.vmem [shape: f32[2,1,384], index: 5, kind: input, shape index: {}]   ;;  %s4721_s6 = inlined_call_operand.vmem [shape: bf16[2,128,128], index: 6, kind: input, shape index: {}]   ;;  %s4722_s7 = inlined_call_operand.vmem [shape: f32[2,1,128], index: 7, kind: input, shape index: {}]   ;;  %s4723_s8 = inlined_call_operand.hbm [shape: f32[2,1,128], index: 8, kind: input, shape index: {}]   ;;  %s4724_s9 = inlined_call_operand.hbm [shape: f32[2,1,128], index: 9, kind: input, shape index: {}]   ;;  %s4725_s10 = inlined_call_operand.hbm [shape: bf16[2,128,256], index: 10, kind: input, shape index: {}]   ;;  %s4726_s11 = inlined_call_operand.vmem [shape: f32[2,1,256], index: 11, kind: input, shape index: {}]   ;;  %s4727_s12 = inlined_call_operand.hbm [shape: bf16[2,256,128], index: 12, kind: input, shape index: {}]   ;;  %s4728_s13 = inlined_call_operand.vmem [shape: f32[2,1,128], index: 13, kind: input, shape index: {}]   ;;  %s4729_s14 = inlined_call_operand.hbm [shape: f32[2,1,128], index: 14, kind: input, shape index: {}]   ;;  %s4730_s15 = inlined_call_operand.hbm [shape: f32[2,1,128], index: 15, kind: input, shape index: {}]   ;;  %s4731_s16 = inlined_call_operand.vmem [shape: bf16[128,128], index: 16, kind: input, shape index: {}]   ;;  %s4732_s17 = inlined_call_operand.hbm [shape: f32[1,128], index: 17, kind: input, shape index: {}]   ;;  %s4733_s18 = inlined_call_operand.vmem [shape: bf16[128,128], index: 18, kind: input, shape index: {}]   ;;  %s4734_s19 = inlined_call_operand.hbm [shape: f32[1,128], index: 19, kind: input, shape index: {}]   ;;  %s4735_s20 = inlined_call_operand.vmem [shape: f32[2,8,128], index: 20, kind: output, shape index: {}]  }
   0x1   :  { %4769 = sst [smem:[#allocation33_spill]] %s4715_s0 }
   0x2   :  { %4770 = sst [smem:[#allocation34_spill]] %s4716_s1 }
   0x3   :  { %4771 = sst [smem:[#allocation35_spill]] %s4717_s2 }
   0x4   :  { %4772 = sst [smem:[#allocation36_spill]] %s4718_s3 }
   0x5   :  { %4773 = sst [smem:[#allocation37_spill]] %s4719_s4 }
   0x6   :  { %4774 = sst [smem:[#allocation38_spill]] %s4720_s5 }
   0x7   :  { %4775 = sst [smem:[#allocation39_spill]] %s4721_s6 }
   0x8   :  { %4776 = sst [smem:[#allocation40_spill]] %s4722_s7 }
   0x9   :  { %4777 = sst [smem:[#allocation41_spill]] %s4723_s8 }
   0xa   :  { %4778 = sst [smem:[#allocation42_spill]] %s4724_s9 }
   0xb   :  { %4779 = sst [smem:[#allocation43_spill]] %s4725_s10 }
   0xc   :  { %4780 = sst [smem:[#allocation44_spill]] %s4726_s11 }
   0xd   :  { %4781 = sst [smem:[#allocation45_spill]] %s4727_s12 }
   0xe   :  { %4782 = sst [smem:[#allocation46_spill]] %s4728_s13 }
   0xf   :  { %4783 = sst [smem:[#allocation47_spill]] %s4729_s14 }
  0x10   :  { %4784 = sst [smem:[#allocation48_spill]] %s4730_s15 }
  0x11   :  { %4785 = sst [smem:[#allocation49_spill]] %s4731_s16 }
  0x12   :  { %4786 = sst [smem:[#allocation50_spill]] %s4732_s17 }
  0x13   :  { %4787 = sst [smem:[#allocation51_spill]] %s4733_s18 }
  0x14   :  { %4788 = sst [smem:[#allocation52_spill]] %s4734_s19 }
  0x15   :  { %4789 = sst [smem:[#allocation53_spill]] %s4735_s20 }
  0x16   :  { %25 = vsyncpa [#allocation4], 0 }
  0x17   :  { %26 = vsyncpa [#allocation6], 0 }
  0x18   :  { %27 = vsyncpa [#allocation16], 0  ;;  %s3978_s1 = smov 0   ;;  %s3980_s22 = smov 0  }
  0x19   :  { %s3982_s23 = smov 0   ;;  %s3984_s24 = smov 0  }
  0x1a   :  { %s3986_s2 = smov 0   ;;  %s3988_s25 = smov 0  }
  0x1b   :  { %s3990_s3 = smov 0   ;;  %s3992_s26 = smov 0  }
  0x1c LB: > { %4790 = sst [smem:[#allocation22_spill]] %s3822_s22  ;;  %s4739_s27 = sadd.s32 4294967295, %s3846_s26   ;;  %s3846_s26 = sphi %s3992_s26, %s33_s26   ;;  %s3842_s3 = sphi %s3990_s3, %s4867_s3   ;;  %s3838_s25 = sphi %s3988_s25, %s4866_s25   ;;  %s3834_s2 = sphi %s3986_s2, %s4865_s2   ;;  %s3830_s24 = sphi %s3984_s24, %s4864_s24   ;;  %s3826_s23 = sphi %s3982_s23, %s4863_s23   ;;  %s3822_s22 = sphi %s3980_s22, %s4862_s22   ;;  %s3818_s1 = sphi %s3978_s1, %s4861_s1  }
  0x1d   : > { %4791 = sst [smem:[#allocation23_spill]] %s3826_s23  ;;  %p153_p0 = scmp.ne.s32.totalorder %s3826_s23, %s3822_s22 }
  0x1e   : > { %4792 = sst [smem:[#allocation24_spill]] %s3830_s24  ;;  %p154_p1 = scmp.eq.s32.totalorder %s3846_s26, 0 }
  0x1f   : > { %4793 = sst [smem:[#allocation25_spill]] %s3834_s2  ;;  %p159_p2 = scmp.ne.s32.totalorder %s3822_s22, %s3818_s1 }
  0x20   : > { %4794 = sst [smem:[#allocation26_spill]] %s3838_s25  ;;  %p4024_p3 = scmp.eq.s32.totalorder %s4739_s27, 0 }
  0x21   : > { %4795 = sst [smem:[#allocation27_spill]] %s3842_s3  ;;  %p155_p4 = por %p154_p1, %p153_p0 }
  0x22   : > { %4796 = sst [smem:[#allocation28_spill]] %s3846_s26  ;;  %p2825_p5 = scmp.ge.s32.totalorder %s3846_s26, 1 }
  0x23   : > { %s4797_s4 = scalar_select %p4024_p3, 1, 0 }
  0x24   : > { %p4031_p6 = por %p4024_p3, %p159_p2  ;;  %p566_p7 = scmp.lt.s32.totalorder %s3846_s26, 5 }
  0x25   : > { %s3848_s0 = smov [#allocation3]   ;;  %p3233_p10 = scmp.lt.s32.totalorder %s3846_s26, 4 }
  0x26   : > { %s4798_s29 = scalar_select %p4031_p6, 1, 0 }
  0x27   : > { %p4036_p8 = pnand %p2825_p5, %p566_p7  ;;  %s579_s21 = sshll.u32 %s3848_s0, 4  ;;  %s580_s21 = int_to_ptr.vmem [resolvable:$true] %s579_s21 }
  0x28   : > { %4799 = sst [smem:[#allocation29_spill]] %s4798_s29  ;;  %p4049_p12 = pnand %p3233_p10, %p155_p4 }
  0x29   : > { %s4800_s30 = scalar_select %p4036_p8, 1, 0 }
  0x2a   : > { %p3194_p9 = pneg %p4036_p8  ;;  %s4803_s16 = sld [smem:[#allocation35_spill]] }
  0x2b   : > { %s4802_s27 = scalar_select %p4049_p12, 1, 0 }
  0x2c   : > { %p4045_p11 = pnand %p3194_p9, %p4024_p3 }
  0x2e   : > { %s4801_s1 = scalar_select %p4045_p11, 1, 0 }
  0x2f   : > { %p4061_p0 = pneg %p4045_p11 }
  0x30   : > { %s3442_s20 = scalar_lea.hbm %s4803_s16, 16 }
  0x31   : > { %p3443_p13 = scmp.ne.s32.totalorder %s4803_s16, %s3442_s20  ;;  %p3449_p4 = scmp.lt.u32.totalorder %s3442_s20, %s4803_s16 }
  0x32   : > { %s4804_s13 = scalar_select %p4061_p0, 1, 0 }
  0x33   : > { %p3445_p1 = pnand %p4061_p0, %p3443_p13 }
  0x35   : > { %p3446_p2 = pneg %p3445_p1 }
  0x37   : > { %p3451_p5 = pnand %p3449_p4, %p3446_p2 }
  0x39   : > { %3454 = shalt.err (!%p3451_p5)
}
  0x3a   : > { %s3455_s18 = scalar_lea.vmem %s580_s21, 16  ;;  %s3462_s11 = scalar_lea.vmem %s580_s21, 32 }
  0x3b   : > { %p3456_p7 = scmp.ne.s32.totalorder %s580_s21, %s3455_s18  ;;  %p3463_p6 = scmp.lt.s32.totalorder %s580_s21, %s580_s21 }
  0x3c   : > { %p3464_p3 = scmp.lt.s32.totalorder %s3462_s11, %s3455_s18 }
  0x3d   : > { %p3458_p9 = pnand %p3456_p7, %p4061_p0 }
  0x3e   : > { %p3465_p8 = por %p3464_p3, %p3463_p6 }
  0x3f   : > { %p3459_p10 = pneg %p3458_p9 }
  0x41   : > { %p3466_p12 = pnand %p3465_p8, %p3459_p10 }
  0x43   : > { %3469 = shalt.err (!%p3466_p12)
}
  0x44   : > { %3197 = dma.hbm_to_vmem [thread:$0]  (!%p4045_p11), %s4803_s16, 16, %s580_s21, [#allocation4]  }
  0x45   : > { %s42_s5 = sadd.s32 1, %s3838_s25  ;;  %s45_s6 = sadd.s32 1, %s3842_s3 }
  0x46   : > { %p43_p3 = scmp.ge.s32.totalorder %s42_s5, 2  ;;  %s642_s20 = sand.u32 1, %s3846_s26  }
  0x47   : > { %s4081_s18 = sand.u32 1, %s3826_s23   ;;  %s3161_s0 = smul.u32 3072, %s3838_s25 }
  0x48   : > { %s4869_s5 = smov (%p43_p3, %s42_s5), 0  ;;  %s4871_s6 = smov (!%p43_p3, %s45_s6), %s3842_s3 }
  0x49   : > { %4805 = sst [smem:[#allocation30_spill]] %s4869_s5  ;;  %s143_s11 = ssub.s32 %s3838_s25, %s4869_s5 }
  0x4a   : > { %s3160_s28 = smul.u32 192, %s4081_s18  ;;  %p47_p6 = scmp.ge.s32.totalorder %s4871_s6, 2 }
  0x4b   : > { %p144_p8 = scmp.eq.s32.totalorder %s143_s11, 0  ;;  %s4807_s21 = sadd.s32 1, %s3826_s23 }
  0x4c   : > { %s4873_s6 = smov (%p47_p6, %s4871_s6), 0  ;;  %s4809_s2 = sld [smem:[#allocation37_spill]] }
  0x4d   : > { %4806 = sst [smem:[#allocation31_spill]] %s4873_s6  ;;  %s646_s3 = scalar_lea.vmem [#allocation7], %s3160_s28 }
  0x4e   : > { %s4095_s16 = scalar_select %p144_p8, %s3826_s23, %s4807_s21  }
  0x4f   : > { %s653_s5 = sshll.u32 %s646_s3, 4  ;;  %s4104_s11 = scalar_lea.sflag [#allocation4], %s642_s20  ;;  %s4102_s5 = int_to_ptr.vmem [resolvable:$true] %s653_s5 }
  0x50   : > { %4808 = sst [smem:[#allocation32_spill]] %s4095_s16  ;;  %p4811_p13 = scmp.ne.s32.totalorder %s4802_s27, 0 }
  0x52   : > { %s4810_s29 = smov %s4809_s2  ;;  %s4100_s22 = scalar_lea.hbm %s4809_s2, %s3161_s0 }
  0x53   : > { %s3470_s26 = scalar_lea.hbm %s4100_s22, 3072  ;;  %p4110_p1 = pneg %p4811_p13 }
  0x54   : > { %p3471_p12 = scmp.ne.s32.totalorder %s4100_s22, %s3470_s26  ;;  %s3475_s2 = scalar_lea.hbm %s4810_s29, 6144 }
  0x55   : > { %s4812_s21 = scalar_select %p4110_p1, 1, 0 }
  0x56   : > { %p3473_p2 = pnand %p4110_p1, %p3471_p12  ;;  %p3476_p5 = scmp.lt.u32.totalorder %s4100_s22, %s4810_s29 }
  0x57   : > { %p3477_p7 = scmp.lt.u32.totalorder %s3475_s2, %s3470_s26  ;;  %p3479_p10 = scmp.lt.u32.totalorder %s3470_s26, %s4100_s22 }
  0x58   : > { %p3474_p4 = pneg %p3473_p2 }
  0x59   : > { %p3478_p9 = por %p3477_p7, %p3476_p5 }
  0x5b   : > { %p3480_p3 = por %p3479_p10, %p3478_p9 }
  0x5d   : > { %p3481_p6 = pnand %p3480_p3, %p3474_p4 }
  0x5f   : > { %3484 = shalt.err (!%p3481_p6)
}
  0x60   : > { %s3485_s20 = scalar_lea.vmem %s4102_s5, 3072  ;;  %s3849_s0 = smov [#allocation7]  }
  0x61   : > { %p3486_p8 = scmp.ne.s32.totalorder %s4102_s5, %s3485_s20  ;;  %s3490_s7 = sshll.u32 %s3849_s0, 4  ;;  %s3491_s7 = int_to_ptr.vmem [resolvable:$false] %s3490_s7 }
  0x62   : > { %s3492_s24 = scalar_lea.vmem %s3491_s7, 6144  ;;  %p3493_p11 = scmp.lt.s32.totalorder %s4102_s5, %s3491_s7 }
  0x63   : > { %p3488_p12 = pnand %p3486_p8, %p4110_p1  ;;  %p3494_p0 = scmp.lt.s32.totalorder %s3492_s24, %s3485_s20 }
  0x65   : > { %p3489_p2 = pneg %p3488_p12  ;;  %p3495_p5 = por %p3494_p0, %p3493_p11 }
  0x67   : > { %p3496_p7 = pnand %p3495_p5, %p3489_p2 }
  0x69   : > { %3499 = shalt.err (!%p3496_p7)
}
  0x6a   : > { %s3850_s26 = smov 192   ;;  %s3851_s2 = smov 12  }
  0x6b   : > { %3210 = dma.hbm_to_vmem [thread:$0]  (!%p4811_p13), %s4100_s22, 3072, %s4102_s5, %s4104_s11, %s3850_s26, %s3850_s26, %s3851_s2  }
  0x6c   : > { %s4135_s3 = sshll.u32 %s3838_s25, 4  ;;  %s687_s28 = scalar_lea.vmem [#allocation8], %s4081_s18 }
  0x6d   : > { %s694_s0 = sshll.u32 %s687_s28, 4  ;;  %s4813_s8 = sld [smem:[#allocation41_spill]]  ;;  %s695_s0 = int_to_ptr.vmem [resolvable:$true] %s694_s0 }
  0x73   : > { %s692_s24 = scalar_lea.hbm %s4813_s8, %s4135_s3  ;;  %s3505_s23 = scalar_lea.hbm %s4813_s8, 32 }
  0x74   : > { %s3500_s29 = scalar_lea.hbm %s692_s24, 16  ;;  %p3506_p9 = scmp.lt.u32.totalorder %s692_s24, %s4813_s8 }
  0x75   : > { %p3501_p11 = scmp.ne.s32.totalorder %s692_s24, %s3500_s29  ;;  %p3507_p10 = scmp.lt.u32.totalorder %s3505_s23, %s3500_s29 }
  0x76   : > { %p3509_p6 = scmp.lt.u32.totalorder %s3500_s29, %s692_s24 }
  0x77   : > { %p3503_p0 = pnand %p3501_p11, %p4110_p1  ;;  %p3508_p3 = por %p3507_p10, %p3506_p9 }
  0x79   : > { %p3504_p4 = pneg %p3503_p0  ;;  %p3510_p8 = por %p3509_p6, %p3508_p3 }
  0x7b   : > { %p3511_p12 = pnand %p3510_p8, %p3504_p4 }
  0x7d   : > { %3514 = shalt.err (!%p3511_p12)
}
  0x7e   : > { %s3515_s26 = scalar_lea.vmem %s695_s0, 16  ;;  %s3852_s2 = smov [#allocation8]  }
  0x7f   : > { %p3516_p2 = scmp.ne.s32.totalorder %s695_s0, %s3515_s26  ;;  %s3520_s28 = sshll.u32 %s3852_s2, 4  ;;  %s3521_s28 = int_to_ptr.vmem [resolvable:$false] %s3520_s28 }
  0x80   : > { %s3522_s16 = scalar_lea.vmem %s3521_s28, 32  ;;  %p3523_p11 = scmp.lt.s32.totalorder %s695_s0, %s3521_s28 }
  0x81   : > { %p3518_p5 = pnand %p3516_p2, %p4110_p1  ;;  %p3524_p0 = scmp.lt.s32.totalorder %s3522_s16, %s3515_s26 }
  0x83   : > { %p3519_p7 = pneg %p3518_p5  ;;  %p3525_p13 = por %p3524_p0, %p3523_p11 }
  0x85   : > { %p3526_p9 = pnand %p3525_p13, %p3519_p7 }
  0x87   : > { %3529 = shalt.err (!%p3526_p9)
}
  0x88   : > { %p4814_p10 = scmp.ne.s32.totalorder %s4802_s27, 0  ;;  %s4815_s9 = sld [smem:[#allocation42_spill]] }
  0x89   : > { %s704_s20 = scalar_lea.vmem [#allocation9], %s4081_s18  ;;  %s2834_s22 = sshll.u32 %s4081_s18, 7 }
  0x8a   : > { %3213 = dma.hbm_to_vmem [thread:$0]  (!%p4814_p10), %s692_s24, 16, %s695_s0, %s4104_s11  }
  0x8b   : > { %s711_s7 = sshll.u32 %s704_s20, 4  ;;  %s712_s7 = int_to_ptr.vmem [resolvable:$true] %s711_s7 }
  0x8e   : > { %s4159_s6 = scalar_lea.hbm %s4815_s9, %s4135_s3  ;;  %s3535_s24 = scalar_lea.hbm %s4815_s9, 32 }
  0x8f   : > { %s3530_s5 = scalar_lea.hbm %s4159_s6, 16  ;;  %p3536_p6 = scmp.lt.u32.totalorder %s4159_s6, %s4815_s9 }
  0x90   : > { %p3531_p13 = scmp.ne.s32.totalorder %s4159_s6, %s3530_s5  ;;  %p3537_p8 = scmp.lt.u32.totalorder %s3535_s24, %s3530_s5 }
  0x91   : > { %p3539_p2 = scmp.lt.u32.totalorder %s3530_s5, %s4159_s6 }
  0x92   : > { %p3533_p4 = pnand %p3531_p13, %p4110_p1  ;;  %p3538_p12 = por %p3537_p8, %p3536_p6 }
  0x94   : > { %p3534_p3 = pneg %p3533_p4  ;;  %p3540_p5 = por %p3539_p2, %p3538_p12 }
  0x96   : > { %p3541_p7 = pnand %p3540_p5, %p3534_p3 }
  0x98   : > { %3544 = shalt.err (!%p3541_p7)
}
  0x99   : > { %s3545_s16 = scalar_lea.vmem %s712_s7, 16  ;;  %s3853_s23 = smov [#allocation9]  }
  0x9a   : > { %p3546_p11 = scmp.ne.s32.totalorder %s712_s7, %s3545_s16  ;;  %s3550_s29 = sshll.u32 %s3853_s23, 4  ;;  %s3551_s29 = int_to_ptr.vmem [resolvable:$false] %s3550_s29 }
  0x9b   : > { %s3552_s20 = scalar_lea.vmem %s3551_s29, 32  ;;  %p3553_p13 = scmp.lt.s32.totalorder %s712_s7, %s3551_s29 }
  0x9c   : > { %p3548_p0 = pnand %p3546_p11, %p4110_p1  ;;  %p3554_p4 = scmp.lt.s32.totalorder %s3552_s20, %s3545_s16 }
  0x9e   : > { %p3549_p9 = pneg %p3548_p0  ;;  %p3555_p10 = por %p3554_p4, %p3553_p13 }
  0xa0   : > { %p3556_p6 = pnand %p3555_p10, %p3549_p9 }
  0xa2   : > { %3559 = shalt.err (!%p3556_p6)
}
  0xa3   : > { %p4816_p8 = scmp.ne.s32.totalorder %s4802_s27, 0  ;;  %s2955_s5 = sshll.u32 %s3838_s25, 11 }
  0xa4   : > { %s722_s26 = scalar_lea.vmem [#allocation10], %s2834_s22  ;;  %s4817_s10 = sld [smem:[#allocation43_spill]] }
  0xa5   : > { %3216 = dma.hbm_to_vmem [thread:$0]  (!%p4816_p8), %s4159_s6, 16, %s712_s7, %s4104_s11  }
  0xa6   : > { %s729_s0 = sshll.u32 %s722_s26, 4  ;;  %s4191_s0 = int_to_ptr.vmem [resolvable:$true] %s729_s0 }
  0xaa   : > { %s4189_s28 = scalar_lea.hbm %s4817_s10, %s2955_s5  ;;  %s3565_s23 = scalar_lea.hbm %s4817_s10, 4096 }
  0xab   : > { %s3560_s16 = scalar_lea.hbm %s4189_s28, 2048  ;;  %p3566_p2 = scmp.lt.u32.totalorder %s4189_s28, %s4817_s10 }
  0xac   : > { %p3561_p10 = scmp.ne.s32.totalorder %s4189_s28, %s3560_s16  ;;  %p3567_p5 = scmp.lt.u32.totalorder %s3565_s23, %s3560_s16 }
  0xad   : > { %p3569_p11 = scmp.lt.u32.totalorder %s3560_s16, %s4189_s28 }
  0xae   : > { %p3563_p3 = pnand %p3561_p10, %p4110_p1  ;;  %p3568_p7 = por %p3567_p5, %p3566_p2 }
  0xb0   : > { %p3564_p12 = pneg %p3563_p3  ;;  %p3570_p0 = por %p3569_p11, %p3568_p7 }
  0xb2   : > { %p3571_p9 = pnand %p3570_p0, %p3564_p12 }
  0xb4   : > { %3574 = shalt.err (!%p3571_p9)
}
  0xb5   : > { %s3575_s26 = scalar_lea.vmem %s4191_s0, 2048  ;;  %s3854_s24 = smov [#allocation10]  }
  0xb6   : > { %p3576_p13 = scmp.ne.s32.totalorder %s4191_s0, %s3575_s26  ;;  %s3580_s2 = sshll.u32 %s3854_s24, 4  ;;  %s3581_s2 = int_to_ptr.vmem [resolvable:$false] %s3580_s2 }
  0xb7   : > { %s3582_s6 = scalar_lea.vmem %s3581_s2, 4096  ;;  %p3583_p10 = scmp.lt.s32.totalorder %s4191_s0, %s3581_s2 }
  0xb8   : > { %p3578_p4 = pnand %p3576_p13, %p4110_p1  ;;  %p3584_p3 = scmp.lt.s32.totalorder %s3582_s6, %s3575_s26 }
  0xba   : > { %p3579_p6 = pneg %p3578_p4  ;;  %p3585_p2 = por %p3584_p3, %p3583_p10 }
  0xbc   : > { %p3586_p5 = pnand %p3585_p2, %p3579_p6 }
  0xbe   : > { %3589 = shalt.err (!%p3586_p5)
}
  0xbf   : > { %s3855_s16 = smov 128   ;;  %s3856_s7 = smov 8  }
  0xc0   : > { %3219 = dma.hbm_to_vmem [thread:$0]  (!%p4816_p8), %s4189_s28, 2048, %s4191_s0, %s4104_s11, %s3855_s16, %s3855_s16, %s3856_s7  }
  0xc1   : > { %s4818_s12 = sld [smem:[#allocation45_spill]]  ;;  %s750_s26 = scalar_lea.vmem [#allocation11], %s2834_s22 }
  0xc2   : > { %s757_s24 = sshll.u32 %s750_s26, 4  ;;  %s4224_s24 = int_to_ptr.vmem [resolvable:$true] %s757_s24 }
  0xc7   : > { %s4220_s20 = scalar_lea.hbm %s4818_s12, %s2955_s5  ;;  %s3595_s6 = scalar_lea.hbm %s4818_s12, 4096 }
  0xc8   : > { %s3590_s2 = scalar_lea.hbm %s4220_s20, 2048  ;;  %p3596_p0 = scmp.lt.u32.totalorder %s4220_s20, %s4818_s12 }
  0xc9   : > { %p3591_p12 = scmp.ne.s32.totalorder %s4220_s20, %s3590_s2  ;;  %p3597_p9 = scmp.lt.u32.totalorder %s3595_s6, %s3590_s2 }
  0xca   : > { %p3599_p4 = scmp.lt.u32.totalorder %s3590_s2, %s4220_s20 }
  0xcb   : > { %p3593_p7 = pnand %p3591_p12, %p4110_p1  ;;  %p3598_p13 = por %p3597_p9, %p3596_p0 }
  0xcd   : > { %p3594_p11 = pneg %p3593_p7  ;;  %p3600_p6 = por %p3599_p4, %p3598_p13 }
  0xcf   : > { %p3601_p10 = pnand %p3600_p6, %p3594_p11 }
  0xd1   : > { %3604 = shalt.err (!%p3601_p10)
}
  0xd2   : > { %s3605_s22 = scalar_lea.vmem %s4224_s24, 2048  ;;  %s3857_s7 = smov [#allocation11]  }
  0xd3   : > { %p3606_p3 = scmp.ne.s32.totalorder %s4224_s24, %s3605_s22  ;;  %s3610_s23 = sshll.u32 %s3857_s7, 4  ;;  %s3611_s23 = int_to_ptr.vmem [resolvable:$false] %s3610_s23 }
  0xd4   : > { %s3612_s29 = scalar_lea.vmem %s3611_s23, 4096  ;;  %p3613_p12 = scmp.lt.s32.totalorder %s4224_s24, %s3611_s23 }
  0xd5   : > { %p3608_p2 = pnand %p3606_p3, %p4110_p1  ;;  %p3614_p7 = scmp.lt.s32.totalorder %s3612_s29, %s3605_s22 }
  0xd7   : > { %p3609_p5 = pneg %p3608_p2  ;;  %p3615_p0 = por %p3614_p7, %p3613_p12 }
  0xd9   : > { %p3616_p9 = pnand %p3615_p0, %p3609_p5 }
  0xdb   : > { %3619 = shalt.err (!%p3616_p9)
}
  0xdc   : > { %s3858_s26 = smov 64   ;;  %s3859_s2 = smov 4  }
  0xdd   : > { %3222 = dma.hbm_to_vmem [thread:$0]  (!%p4816_p8), %s4220_s20, 2048, %s4224_s24, %s4104_s11, %s3858_s26, %s3858_s26, %s3859_s2  }
  0xde   : > { %s3860_s0 = smov [#allocation5]   ;;  %s4819_s14 = sld [smem:[#allocation47_spill]] }
  0xdf   : > { %s590_s28 = sshll.u32 %s3860_s0, 4  ;;  %s776_s22 = scalar_lea.vmem [#allocation12], %s4081_s18  ;;  %s591_s28 = int_to_ptr.vmem [resolvable:$true] %s590_s28 }
  0xe0   : > { %s783_s7 = sshll.u32 %s776_s22, 4  ;;  %s4820_s8 = sld [smem:[#allocation36_spill]]  ;;  %s784_s7 = int_to_ptr.vmem [resolvable:$true] %s783_s7 }
  0xe1   : > { %p4821_p13 = scmp.ne.s32.totalorder %s4804_s13, 0 }
  0xe4   : > { %s4252_s16 = scalar_lea.hbm %s4819_s14, %s4135_s3 }
  0xe6   : > { %s3620_s9 = scalar_lea.hbm %s4820_s8, 16 }
  0xe7   : > { %p3621_p11 = scmp.ne.s32.totalorder %s4820_s8, %s3620_s9  ;;  %p3627_p10 = scmp.lt.u32.totalorder %s3620_s9, %s4820_s8 }
  0xe9   : > { %p3623_p4 = pnand %p3621_p11, %p4821_p13 }
  0xeb   : > { %p3624_p6 = pneg %p3623_p4 }
  0xed   : > { %p3629_p3 = pnand %p3627_p10, %p3624_p6 }
  0xef   : > { %3632 = shalt.err (!%p3629_p3)
}
  0xf0   : > { %s3633_s26 = scalar_lea.vmem %s591_s28, 16  ;;  %s3640_s2 = scalar_lea.vmem %s591_s28, 32 }
  0xf1   : > { %p3634_p2 = scmp.ne.s32.totalorder %s591_s28, %s3633_s26  ;;  %p3641_p7 = scmp.lt.s32.totalorder %s591_s28, %s591_s28 }
  0xf2   : > { %p3642_p0 = scmp.lt.s32.totalorder %s3640_s2, %s3633_s26 }
  0xf3   : > { %p3636_p5 = pnand %p3634_p2, %p4821_p13 }
  0xf4   : > { %p3643_p9 = por %p3642_p0, %p3641_p7 }
  0xf5   : > { %p3637_p12 = pneg %p3636_p5 }
  0xf7   : > { %p3644_p8 = pnand %p3643_p9, %p3637_p12 }
  0xf9   : > { %3647 = shalt.err (!%p3644_p8)
}
  0xfa   : > { %p4822_p11 = scmp.ne.s32.totalorder %s4801_s1, 0  ;;  %s3648_s9 = scalar_lea.hbm %s4252_s16, 16 }
  0xfb   : > { %p3649_p4 = scmp.ne.s32.totalorder %s4252_s16, %s3648_s9  ;;  %s3653_s5 = scalar_lea.hbm %s4819_s14, 32 }
  0xfc   : > { %3200 = dma.hbm_to_vmem [thread:$0]  (!%p4822_p11), %s4820_s8, 16, %s591_s28, [#allocation6]  }
  0xfd   : > { %p3651_p6 = pnand %p3649_p4, %p4110_p1  ;;  %p3654_p8 = scmp.lt.u32.totalorder %s4252_s16, %s4819_s14 }
  0xfe   : > { %p3655_p3 = scmp.lt.u32.totalorder %s3653_s5, %s3648_s9  ;;  %p3657_p5 = scmp.lt.u32.totalorder %s3648_s9, %s4252_s16 }
  0xff   : > { %p3652_p10 = pneg %p3651_p6 }
 0x100   : > { %p3656_p2 = por %p3655_p3, %p3654_p8 }
 0x102   : > { %p3658_p12 = por %p3657_p5, %p3656_p2 }
 0x104   : > { %p3659_p7 = pnand %p3658_p12, %p3652_p10 }
 0x106   : > { %3662 = shalt.err (!%p3659_p7)
}
 0x107   : > { %s3663_s28 = scalar_lea.vmem %s784_s7, 16  ;;  %s3861_s29 = smov [#allocation12]  }
 0x108   : > { %p3664_p0 = scmp.ne.s32.totalorder %s784_s7, %s3663_s28  ;;  %s3668_s20 = sshll.u32 %s3861_s29, 4  ;;  %s3669_s20 = int_to_ptr.vmem [resolvable:$false] %s3668_s20 }
 0x109   : > { %s3670_s24 = scalar_lea.vmem %s3669_s20, 32  ;;  %p3671_p6 = scmp.lt.s32.totalorder %s784_s7, %s3669_s20 }
 0x10a   : > { %p3666_p9 = pnand %p3664_p0, %p4110_p1  ;;  %p3672_p11 = scmp.lt.s32.totalorder %s3670_s24, %s3663_s28 }
 0x10c   : > { %p3667_p4 = pneg %p3666_p9  ;;  %p3673_p13 = por %p3672_p11, %p3671_p6 }
 0x10e   : > { %p3674_p3 = pnand %p3673_p13, %p3667_p4 }
 0x110   : > { %3677 = shalt.err (!%p3674_p3)
}
 0x111   : > { %p4823_p8 = scmp.ne.s32.totalorder %s4802_s27, 0  ;;  %s3862_s26 = smov [#allocation14]  }
 0x112   : > { %s604_s2 = sshll.u32 %s3862_s26, 4  ;;  %s3863_s10 = smov [#allocation15]   ;;  %s605_s2 = int_to_ptr.vmem [resolvable:$true] %s604_s2 }
 0x113   : > { %3225 = dma.hbm_to_vmem [thread:$0]  (!%p4823_p8), %s4252_s16, 16, %s784_s7, %s4104_s11  }
 0x114   : > { %s618_s12 = sshll.u32 %s3863_s10, 4  ;;  %s4824_s17 = sld [smem:[#allocation50_spill]]  ;;  %s619_s12 = int_to_ptr.vmem [resolvable:$true] %s618_s12 }
 0x115   : > { %p4825_p11 = scmp.ne.s32.totalorder %s4804_s13, 0 }
 0x11a   : > { %s3678_s6 = scalar_lea.hbm %s4824_s17, 16 }
 0x11b   : > { %p3679_p13 = scmp.ne.s32.totalorder %s4824_s17, %s3678_s6  ;;  %p3685_p5 = scmp.lt.u32.totalorder %s3678_s6, %s4824_s17 }
 0x11d   : > { %p3681_p10 = pnand %p3679_p13, %p4825_p11 }
 0x11f   : > { %p3682_p2 = pneg %p3681_p10 }
 0x121   : > { %p3687_p12 = pnand %p3685_p5, %p3682_p2 }
 0x123   : > { %3690 = shalt.err (!%p3687_p12)
}
 0x124   : > { %s3691_s16 = scalar_lea.vmem %s605_s2, 16  ;;  %s3698_s7 = scalar_lea.vmem %s605_s2, 32 }
 0x125   : > { %p3692_p7 = scmp.ne.s32.totalorder %s605_s2, %s3691_s16  ;;  %p3699_p4 = scmp.lt.s32.totalorder %s605_s2, %s605_s2 }
 0x126   : > { %p3700_p6 = scmp.lt.s32.totalorder %s3698_s7, %s3691_s16 }
 0x127   : > { %p3694_p0 = pnand %p3692_p7, %p4825_p11 }
 0x128   : > { %p3701_p3 = por %p3700_p6, %p3699_p4 }
 0x129   : > { %p3695_p9 = pneg %p3694_p0 }
 0x12b   : > { %p3702_p8 = pnand %p3701_p3, %p3695_p9 }
 0x12d   : > { %3705 = shalt.err (!%p3702_p8)
}
 0x12e   : > { %p4826_p13 = scmp.ne.s32.totalorder %s4801_s1, 0  ;;  %s4827_s19 = sld [smem:[#allocation52_spill]] }
 0x130   : > { %3203 = dma.hbm_to_vmem [thread:$0]  (!%p4826_p13), %s4824_s17, 16, %s605_s2, [#allocation6]  }
 0x134   : > { %s3706_s10 = scalar_lea.hbm %s4827_s19, 16 }
 0x135   : > { %p3707_p10 = scmp.ne.s32.totalorder %s4827_s19, %s3706_s10  ;;  %p3713_p8 = scmp.lt.u32.totalorder %s3706_s10, %s4827_s19 }
 0x137   : > { %p3709_p2 = pnand %p3707_p10, %p4825_p11 }
 0x139   : > { %p3710_p5 = pneg %p3709_p2 }
 0x13b   : > { %p3715_p12 = pnand %p3713_p8, %p3710_p5 }
 0x13d   : > { %3718 = shalt.err (!%p3715_p12)
}
 0x13e   : > { %s3719_s22 = scalar_lea.vmem %s619_s12, 16  ;;  %s3726_s2 = scalar_lea.vmem %s619_s12, 32 }
 0x13f   : > { %p3720_p7 = scmp.ne.s32.totalorder %s619_s12, %s3719_s22  ;;  %p3727_p4 = scmp.lt.s32.totalorder %s619_s12, %s619_s12 }
 0x140   : > { %p3728_p6 = scmp.lt.s32.totalorder %s3726_s2, %s3719_s22 }
 0x141   : > { %p3722_p0 = pnand %p3720_p7, %p4825_p11 }
 0x142   : > { %p3729_p3 = por %p3728_p6, %p3727_p4 }
 0x143   : > { %p3723_p9 = pneg %p3722_p0 }
 0x145   : > { %p3730_p1 = pnand %p3729_p3, %p3723_p9 }
 0x147   : > { %3733 = shalt.err (!%p3730_p1)
}
 0x148   : > { %3206 = dma.hbm_to_vmem [thread:$0]  (!%p4826_p13), %s4827_s19, 16, %s619_s12, [#allocation16]  }
 0x149   : > { %s4828_s15 = sld [smem:[#allocation48_spill]]  ;;  %s793_s29 = scalar_lea.vmem [#allocation13], %s4081_s18 }
 0x14a   : > { %s800_s20 = sshll.u32 %s793_s29, 4  ;;  %p4829_p11 = scmp.ne.s32.totalorder %s4812_s21, 0  ;;  %s801_s20 = int_to_ptr.vmem [resolvable:$true] %s800_s20 }
 0x14f   : > { %s4331_s13 = scalar_lea.hbm %s4828_s15, %s4135_s3  ;;  %s3739_s12 = scalar_lea.hbm %s4828_s15, 32 }
 0x150   : > { %s3734_s1 = scalar_lea.hbm %s4331_s13, 16  ;;  %p3740_p13 = scmp.lt.u32.totalorder %s4331_s13, %s4828_s15 }
 0x151   : > { %p3735_p1 = scmp.ne.s32.totalorder %s4331_s13, %s3734_s1  ;;  %p3741_p5 = scmp.lt.u32.totalorder %s3739_s12, %s3734_s1 }
 0x152   : > { %p3743_p12 = scmp.lt.u32.totalorder %s3734_s1, %s4331_s13 }
 0x153   : > { %p3737_p10 = pnand %p3735_p1, %p4829_p11  ;;  %p3742_p8 = por %p3741_p5, %p3740_p13 }
 0x155   : > { %p3738_p2 = pneg %p3737_p10  ;;  %p3744_p7 = por %p3743_p12, %p3742_p8 }
 0x157   : > { %p3745_p0 = pnand %p3744_p7, %p3738_p2 }
 0x159   : > { %3748 = shalt.err (!%p3745_p0)
}
 0x15a   : > { %s3749_s18 = scalar_lea.vmem %s801_s20, 16  ;;  %s3864_s3 = smov [#allocation13]  }
 0x15b   : > { %p3750_p9 = scmp.ne.s32.totalorder %s801_s20, %s3749_s18  ;;  %s3754_s0 = sshll.u32 %s3864_s3, 4  ;;  %s3755_s0 = int_to_ptr.vmem [resolvable:$false] %s3754_s0 }
 0x15c   : > { %s3756_s6 = scalar_lea.vmem %s3755_s0, 32  ;;  %p3757_p3 = scmp.lt.s32.totalorder %s801_s20, %s3755_s0 }
 0x15d   : > { %p3752_p4 = pnand %p3750_p9, %p4829_p11  ;;  %p3758_p1 = scmp.lt.s32.totalorder %s3756_s6, %s3749_s18 }
 0x15f   : > { %p3753_p6 = pneg %p3752_p4  ;;  %p3759_p10 = por %p3758_p1, %p3757_p3 }
 0x161   : > { %p3760_p5 = pnand %p3759_p10, %p3753_p6 }
 0x163   : > { %3763 = shalt.err (!%p3760_p5)
}
 0x164   : > { %p4830_p13 = scmp.ne.s32.totalorder %s4802_s27, 0  ;;  %p4831_p2 = scmp.ne.s32.totalorder %s4800_s30, 0 }
 0x165   : > { %p4832_p11 = scmp.ne.s32.totalorder (!%p4831_p2), %s4797_s4, 0 }
 0x166   : > { %3228 = dma.hbm_to_vmem [thread:$0]  (!%p4830_p13), %s4331_s13, 16, %s801_s20, %s4104_s11  }
 0x167   : > { %809 = sbr.rel (%p4831_p2) target bundleno = 3701 (0xe75), region = 100 }
 0x16e   : > { %3797 = dma.done.wait (%p4832_p11), [#allocation4], 16  }
 0x16f   : > { %3799 = vsyncadd (%p4832_p11), [#allocation4], 4294967280 }
 0x170   : > { %3801 = dma.done.wait (%p4832_p11), [#allocation6], 16  }
 0x171   : > { %3803 = vsyncadd (%p4832_p11), [#allocation6], 4294967280  ;;  %s4833_s21 = sld [smem:[#allocation28_spill]]  ;;  %s4835_s5 = sld [smem:[#allocation22_spill]] }
 0x172   : > { %s4836_s22 = sld [smem:[#allocation29_spill]] }
 0x177   : > { %s4834_s27 = sadd.s32 4294967295, %s4833_s21   ;;  %s4365_s2 = sand.u32 1, %s4835_s5  }
 0x178   : > { %s819_s11 = sand.u32 1, %s4834_s27   ;;  %s3162_s30 = smul.u32 192, %s4365_s2 }
 0x179   : > { %s820_s23 = scalar_lea.sflag [#allocation4], %s819_s11  ;;  %p4837_p8 = scmp.ne.s32.totalorder %s4836_s22, 0 }
 0x17a   : > { %s4368_s28 = scalar_lea.vmem [#allocation7], %s3162_s30 }
 0x17b   : > { %3805 = dma.done.wait (%p4837_p8), %s820_s23, 7232  }
 0x17c   : > { %3807 = vsyncadd (%p4837_p8), %s820_s23, 4294960064  ;;  %s2845_s16 = sshll.u32 %s4365_s2, 7 }
 0x17d   : > { %s4377_s29 = scalar_lea.vmem [#allocation10], %s2845_s16  ;;  %s4379_s20 = scalar_lea.vmem [#allocation11], %s2845_s16 }
 0x17e   : > { %3809 = dma.done.wait (%p4832_p11), [#allocation6], 16  }
 0x17f   : > { %3811 = vsyncadd (%p4832_p11), [#allocation6], 4294967280 }
 0x180   : > { %3813 = dma.done.wait (%p4832_p11), [#allocation16], 16  }
 0x181   : > { %3815 = vsyncadd (%p4832_p11), [#allocation16], 4294967280  ;;  %s4838_s26 = sld [smem:[#allocation25_spill]]  ;;  %s4839_s12 = sld [smem:[#allocation24_spill]] }
 0x182   : > { %s4841_s27 = sld [smem:[#allocation33_spill]]  ;;  %s4842_s16 = sld [smem:[#allocation40_spill]] }
 0x183   : > { %s4843_s7 = sld [smem:[#allocation38_spill]]  ;;  %s4844_s17 = sld [smem:[#allocation39_spill]] }
 0x184   : > { %s4845_s21 = sld [smem:[#allocation46_spill]]  ;;  %s4846_s25 = sld [smem:[#allocation44_spill]] }
 0x185   : > { %s4847_s13 = sld [smem:[#allocation53_spill]] }
 0x187   : > { %p989_p12 = scmp.lt.s32.totalorder %s4838_s26, 1  ;;  %p996_p7 = scmp.lt.s32.totalorder %s4839_s12, 1 }
 0x188   : > { %p2854_p0 = scmp.ne.s32.totalorder %s4839_s12, 0 }
 0x189   : > { %s4875_s26 = smov (!%p989_p12, %s4838_s26), 1  ;;  %v2855_v9 = vld [vmem:[#allocation3] ss:$0 sm:$0xff] (!%p2854_p0)  ;;  %v2856_v11 = vld [vmem:[#allocation5] ss:$0 sm:$0xff] (!%p2854_p0) }
 0x18a   : > { %s4397_s10 = scalar_select %p996_p7, %s4839_s12, 1 }
 0x18b   : > { %s2849_s9 = sshll.u32 %s4875_s26, 3  ;;  %1023 = sbr.rel (%p2854_p0) target bundleno = 710 (0x2c6), region = 148 }
 0x18c   : > { %s992_s5 = scalar_lea.vmem %s4841_s27, %s2849_s9  ;;  %s3163_s22 = smul.u32 3, %s4397_s10 }
 0x18d   : > { %s2957_s11 = sshll.u32 %s4397_s10, 6  ;;  %s1007_s24 = scalar_lea.vmem %s4842_s16, %s4397_s10  ;;  %v1024_v0 = vld [vmem:[%s992_s5] sm:$0xff] (!%p2854_p0) }
 0x18e   : > { %s4416_s8 = scalar_lea.vmem %s4843_s7, %s3163_s22  ;;  %s4421_s4 = scalar_lea.vmem %s4844_s17, %s2957_s11  ;;  %1027 = vadd.xlane.f32.xlu0 (!%p2854_p0), %v1024_v0 }
 0x18f   : > { %s2852_s18 = sshll.u32 %s4397_s10, 1  ;;  %s1014_s27 = scalar_lea.vmem %s4845_s21, %s4397_s10 }
 0x190   : > { %s4431_s30 = scalar_lea.vmem %s4846_s25, %s2852_s18  ;;  %s4436_s7 = scalar_lea.vmem %s4847_s13, %s2849_s9 }
 0x21b   : > { %v1028_v1 = vpop.xlane.xlu0 %1027 }
 0x21c   : > { %v1030_v2 = vmul.f32 0.0078125, %v1028_v1 }
 0x21e   : > { %v1031_v3 = vsub.f32 %v1024_v0, %v1030_v2 }
 0x220   : > { %v1032_v4 = vmul.f32 %v1031_v3, %v1031_v3 }
 0x222   : > { %1033 = vadd.xlane.f32.xlu0 %v1032_v4 }
 0x2af   : > { %v1034_v5 = vpop.xlane.xlu0 %1033 }
 0x2b0   : > { %v1035_v6 = vmul.f32 0.0078125, %v1034_v5 }
 0x2b2   : > { %v1036_v7 = vadd.f32 1e-12, %v1035_v6 }
 0x2b4   : > { %3320 = vrsqrt.f32 %v1036_v7 }
 0x2be   : > { %v3321_v8 = vpop.eup %3320 }
 0x2bf   : > { %v1038_v10 = vmul.f32 %v3321_v8, %v1031_v3 }
 0x2c1   : > { %v1045_v12 = vmul.f32 %v2855_v9, %v1038_v10 }
 0x2c3   : > { %v1052_v13 = vadd.f32 %v2856_v11, %v1045_v12 }
 0x2c5   : > { %1053 = vst [vmem:[#allocation2] sm:$0xff] %v1052_v13 }
 0x2c6 PF: > { %v3322_v14 = vld [vmem:[%s4368_s28 + $0x4] ss:$12 sps:$4 sm:$0xff]   ;;  %v3324_v15 = vld [vmem:[%s4368_s28] ss:$12 sps:$4 sm:$0xff]   ;;  %v3865_v16 = vmov 0   ;;  %v3866_v17 = vmov 0.0   ;;  %v1091_v42 = vlaneseq }
 0x2c7   : > { %1266 = vmatprep.mubr.bf16.mxu0 %v3865_v16  ;;  %3032 = vmatprep.subr.bf16.mxu1 %v3866_v17  ;;  %v3325_v18 = vld [vmem:[%s4368_s28 + $0x1c] ss:$12 sps:$4 sm:$0xff]   ;;  %v3327_v19 = vld [vmem:[%s4368_s28 + $0x18] ss:$12 sps:$4 sm:$0xff]   ;;  %v3328_v20 = vld [vmem:[%s4368_s28 + $0x34] ss:$12 sps:$4 sm:$0xff]  }
 0x2c8   : > { %1234 = vmatprep.subr.bf16.mxu0 %v3322_v14  ;;  %v3330_v21 = vld [vmem:[%s4368_s28 + $0x30] ss:$12 sps:$4 sm:$0xff]   ;;  %v3331_v22 = vld [vmem:[%s4368_s28 + $0x4c] ss:$12 sps:$4 sm:$0xff]   ;;  %v3333_v23 = vld [vmem:[%s4368_s28 + $0x48] ss:$12 sps:$4 sm:$0xff]  }
 0x2c9   : > { %1235 = vmatpush1.bf16.msra.mxu0 %v3324_v15  ;;  %v3346_v24 = vld [vmem:[%s4368_s28 + $0x8] ss:$12 sps:$4 sm:$0xff]   ;;  %v3334_v25 = vld [vmem:[%s4368_s28 + $0x64] ss:$12 sps:$4 sm:$0xff]   ;;  %v3347_v26 = vld [vmem:[%s4368_s28 + $0x20] ss:$12 sps:$4 sm:$0xff]  }
 0x2ca   : > { %1236 = vmatprep.subr.bf16.mxu0 %v3325_v18  ;;  %3033 = vmatpush3.bf16.msra.mxu1 %v3346_v24  ;;  %v3336_v27 = vld [vmem:[%s4368_s28 + $0x60] ss:$12 sps:$4 sm:$0xff]   ;;  %v3337_v28 = vld [vmem:[%s4368_s28 + $0x7c] ss:$12 sps:$4 sm:$0xff]   ;;  %v3339_v29 = vld [vmem:[%s4368_s28 + $0x78] ss:$12 sps:$4 sm:$0xff]  }
 0x2cb   : > { %3034 = vmatprep.subr.bf16.mxu1 %v3866_v17  ;;  %v3348_v30 = vld [vmem:[%s4368_s28 + $0x38] ss:$12 sps:$4 sm:$0xff]   ;;  %v3340_v31 = vld [vmem:[%s4368_s28 + $0x94] ss:$12 sps:$4 sm:$0xff]   ;;  %v3349_v32 = vld [vmem:[%s4368_s28 + $0x50] ss:$12 sps:$4 sm:$0xff]  }
 0x2cc   : > { %v3342_v33 = vld [vmem:[%s4368_s28 + $0x90] ss:$12 sps:$4 sm:$0xff]   ;;  %v3343_v34 = vld [vmem:[%s4368_s28 + $0xac] ss:$12 sps:$4 sm:$0xff]   ;;  %v3350_v35 = vld [vmem:[%s4368_s28 + $0x68] ss:$12 sps:$4 sm:$0xff]  }
 0x2cd   : > { %1237 = vmatpush1.bf16.msra.mxu0 %v3327_v19  ;;  %v3345_v36 = vld [vmem:[%s4368_s28 + $0xa8] ss:$12 sps:$4 sm:$0xff]   ;;  %v3351_v38 = vld [vmem:[%s4368_s28 + $0x80] ss:$12 sps:$4 sm:$0xff]   ;;  %v3352_v40 = vld [vmem:[%s4368_s28 + $0x98] ss:$12 sps:$4 sm:$0xff]  }
 0x2ce   : > { %1238 = vmatprep.subr.bf16.mxu0 %v3328_v20  ;;  %3035 = vmatpush3.bf16.msra.mxu1 %v3347_v26  ;;  %v4465_v37 = vld [vmem:[#allocation2] sm:$0xff]  ;;  %v3353_v41 = vld [vmem:[%s4368_s28 + $0xb0] ss:$12 sps:$4 sm:$0xff]   ;;  %vm3867_vm0 = vmmov 0   ;;  %v4484_v43 = vshrl.u32 %v1091_v42, 7  ;;  %vm1318_vm1 = vcmask 261120  }
 0x2cf   : > { %3036 = vmatprep.subr.bf16.mxu1 %v3866_v17  ;;  %v1056_v39 = vpack.c.bf16 %v4465_v37, %v4465_v37  ;;  %3048 = vmatprep.mubr.msk.bf16.mxu1 %vm3867_vm0, %v3866_v17  ;;  %v1089_v45 = vld [vmem:[%s4416_s8] sm:$0x7]  ;;  %s3868_s14 = smov 64   ;;  %s3869_s8 = smov 96   ;;  %vm1580_vm2 = vcmask 1043456   ;;  %vm1531_vm3 = vcmask 64512  }
 0x2d0   : > { %v1097_v44 = vsub.s32 1, %v4484_v43  ;;  %v4489_v46 = vsub.s32 0, %v4484_v43  ;;  %s3870_s15 = smov 32   ;;  %v1101_v58 = vsub.s32 2, %v4484_v43  ;;  %s4848_s25 = sld [smem:[#allocation34_spill]]  ;;  %vm1785_vm4 = vcmask 523264  }
 0x2d1   : > { %1239 = vmatpush1.bf16.msra.mxu0 %v3330_v21  ;;  %vm1787_vm5 = vcmask 785408   ;;  %s4852_s9 = scalar_lea.vmem [#allocation9], %s4365_s2  ;;  %s4854_s10 = scalar_lea.vmem [#allocation12], %s4365_s2 }
 0x2d2   : > { %1240 = vmatprep.subr.bf16.mxu0 %v3331_v22  ;;  %3037 = vmatpush3.bf16.msra.mxu1 %v3348_v30  ;;  %v1098_v47 = vrot.slane %v1089_v45, %v1097_v44  ;;  %v1094_v48 = vrot.slane %v1089_v45, %v4489_v46  ;;  %v1102_v63 = vrot.slane %v1089_v45, %v1101_v58  ;;  %s4855_s5 = scalar_lea.vmem [#allocation13], %s4365_s2  ;;  %s4856_s22 = sld [smem:[#allocation24_spill]] }
 0x2d3   : > { %3038 = vmatprep.subr.bf16.mxu1 %v3866_v17 }
 0x2d5   : > { %1241 = vmatpush1.bf16.msra.mxu0 %v3333_v23 }
 0x2d6   : > { %1242 = vmatprep.subr.bf16.mxu0 %v3334_v25  ;;  %3039 = vmatpush3.bf16.msra.mxu1 %v3349_v32  ;;  %s4849_s28 = scalar_lea.vmem %s4848_s25, %s4875_s26 }
 0x2d7   : > { %3040 = vmatprep.subr.bf16.mxu1 %v3866_v17  ;;  %v2882_v13 = vld [vmem:[%s4849_s28] ss:$0 sm:$0xff] }
 0x2d8   : > { %p2936_p9 = scmp.ne.s32.totalorder %s4856_s22, 1 }
 0x2d9   : > { %1243 = vmatpush1.bf16.msra.mxu0 %v3336_v27  ;;  %s4857_s18 = sld [smem:[#allocation49_spill]] (!%p2936_p9)  ;;  %vm3872_vm6 = vmmov (!%p2936_p9), 0   ;;  %s4858_s23 = sld [smem:[#allocation51_spill]] (!%p2936_p9) }
 0x2da   : > { %1244 = vmatprep.subr.bf16.mxu0 %v3337_v28  ;;  %3041 = vmatpush3.bf16.msra.mxu1 %v3350_v35 }
 0x2db   : > { %3042 = vmatprep.subr.bf16.mxu1 %v3866_v17 }
 0x2dd   : > { %1245 = vmatpush1.bf16.msra.mxu0 %v3339_v29 }
 0x2de   : > { %1246 = vmatprep.subr.bf16.mxu0 %v3340_v31  ;;  %3043 = vmatpush3.bf16.msra.mxu1 %v3351_v38 }
 0x2df   : > { %3044 = vmatprep.subr.bf16.mxu1 %v3866_v17  ;;  %s4859_s16 = smov (!%p2936_p9), %s4858_s23 }
 0x2e1   : > { %1247 = vmatpush1.bf16.msra.mxu0 %v3342_v33 }
 0x2e2   : > { %1248 = vmatprep.subr.bf16.mxu0 %v3343_v34  ;;  %3045 = vmatpush3.bf16.msra.mxu1 %v3352_v40 }
 0x2e3   : > { %3046 = vmatprep.subr.bf16.mxu1 %v3866_v17 }
 0x2e5   : > { %1249 = vmatpush1.bf16.msra.mxu0 %v3345_v36 }
 0x2e6   : > { %3076 = vmatprep.subr.bf16.mxu0 %v3866_v17  ;;  %3047 = vmatpush3.bf16.msra.mxu1 %v3353_v41 }
 0x2e7   : > { %3052 = vmatprep.subr.bf16.mxu1 %v3866_v17 }
 0x2e8   : > { %1267 = vmatmul.mubr.bf16.vlgmr.msra.gmra.mrb[0].mxu0 %v1056_v39 }
 0x2e9   : > { %3078 = vmatprep.mubr.msk.bf16.mxu0 %vm3867_vm0, %v3866_v17  ;;  %3049 = vmatmul.mubr.bf16.vlgmr.msra.gmra.mrb[0].mxu1 %v1056_v39 }
 0x2ea   : > { %3054 = vmatprep.mubr.msk.bf16.mxu1 %vm3867_vm0, %v3866_v17 }
 0x3bb   : > { %v1268_v49 = vpop.f32.mrb[0].mxu0 }
 0x3bc   : > { %v1270_v50 = vpop.f32.mrb[1].mxu0  ;;  %v1269_v54 = vadd.f32 %v1268_v49, %v1094_v48  ;;  %v1309_v59 = vpop.f32.mrb[0].mxu1 }
 0x3bd   : > { %v1271_v51 = vadd.f32 %v1270_v50, %v1098_v47  ;;  %v1272_v52 = vpop.f32.mrb[2].mxu0  ;;  %v3050_v60 = vpop.f32.mrb[1].mxu1  ;;  %v1310_v0 = vadd.f32 %v1309_v59, %v1102_v63 }
 0x3be   : > { %v1273_v53 = vpop.f32.mrb[3].mxu0  ;;  %v1315_v57 = vpack.c.bf16 %v1269_v54, %v1269_v54  ;;  %v1312_v61 = vpop.f32.mrb[2].mxu1 }
 0x3bf   : > { %v1316_v55 = vpack.c.bf16 %v1271_v51, %v1271_v51  ;;  %v3051_v62 = vpop.f32.mrb[3].mxu1  ;;  %v4506_v1 = vpack.c.bf16 %v1310_v0, %v1310_v0 }
 0x3c1   : > { %1429 = vrot.lane.b32.xlu1 %v1316_v55, %s3868_s14  ;;  %1377 = vrot.lane.b32.xlu0 %v1316_v55, %s3869_s8  ;;  %v1323_v56 = vsel %vm1318_vm1, %v1316_v55, 0  ;;  %v1582_v2 = vsel %vm1580_vm2, %v4506_v1, 0 }
 0x3c2   : > { %3053 = vmatpush3.bf16.xpose.msra.mxu1 %v1323_v56  ;;  %3077 = vmatpush3.bf16.msra.mxu0 %v1582_v2 }
 0x3c3   : > { %3058 = vmatprep.subr.bf16.mxu1 %v3866_v17  ;;  %3088 = vmatprep.subr.bf16.mxu0 %v3866_v17 }
 0x3c5   : > { %1427 = vrot.lane.b32.xlu1 %v1315_v57, %s3868_s14  ;;  %1374 = vrot.lane.b32.xlu0 %v1315_v57, %s3869_s8 }
 0x3c9   : > { %1479 = vrot.lane.b32.xlu1 %v1315_v57, %s3870_s15  ;;  %1481 = vrot.lane.b32.xlu0 %v1316_v55, %s3870_s15 }
 0x3ca   : > { %3055 = vmatmul.mubr.msk.bf16.vlgmr.msra.gmra.mrb[4].mxu1 %vm1318_vm1, %v1315_v57 }
 0x3cb   : > { %3060 = vmatprep.mubr.msk.bf16.mxu1 %vm3867_vm0, %v3866_v17 }
 0x433   : > { %v1378_v3 = vpop.permute.xlu0 %1377  ;;  %v1430_v5 = vpop.permute.xlu1 %1429 }
 0x434   : > { %v1383_v4 = vsel %vm1318_vm1, %v1378_v3, 0  ;;  %v1435_v7 = vsel %vm1318_vm1, %v1430_v5, 0 }
 0x435   : > { %3059 = vmatpush3.bf16.xpose.msra.mxu1 %v1383_v4 }
 0x436   : > { %3064 = vmatprep.subr.bf16.mxu1 %v3866_v17 }
 0x437   : > { %v1375_v6 = vpop.permute.xlu0 %1374  ;;  %v1428_v9 = vpop.permute.xlu1 %1427 }
 0x43b   : > { %v1482_v8 = vpop.permute.xlu0 %1481  ;;  %v1480_v11 = vpop.permute.xlu1 %1479 }
 0x43c   : > { %3061 = vmatmul.mubr.msk.bf16.vlgmr.msra.gmra.mrb[8].mxu1 %vm1318_vm1, %v1375_v6  ;;  %v1487_v10 = vsel %vm1318_vm1, %v1482_v8, 0 }
 0x43d   : > { %3065 = vmatpush3.bf16.xpose.msra.mxu1 %v1435_v7  ;;  %3066 = vmatprep.mubr.msk.bf16.mxu1 %vm3867_vm0, %v3866_v17 }
 0x43e   : > { %3070 = vmatprep.subr.bf16.mxu1 %v3866_v17 }
 0x444   : > { %3067 = vmatmul.mubr.msk.bf16.vlgmr.msra.gmra.mrb[12].mxu1 %vm1318_vm1, %v1428_v9 }
 0x445   : > { %3071 = vmatpush3.bf16.xpose.msra.mxu1 %v1487_v10  ;;  %3072 = vmatprep.mubr.msk.bf16.mxu1 %vm3867_vm0, %v3866_v17 }
 0x446   : > { %3082 = vmatprep.subr.bf16.mxu1 %v3866_v17 }
 0x44c   : > { %3073 = vmatmul.mubr.msk.bf16.vlgmr.msra.gmra.mrb[16].mxu1 %vm1318_vm1, %v1480_v11 }
 0x44d   : > { %3084 = vmatprep.mubr.msk.bf16.mxu1 %vm3867_vm0, %v3866_v17 }
 0x49d   : > { %v1359_v12 = vpop.f32.mrb[4].mxu1 }
 0x49e   : > { %v1365_v14 = vmul.f32 0.17677669, %v1359_v12  ;;  %v3056_v15 = vpop.f32.mrb[5].mxu1 }
 0x49f   : > { %v1362_v18 = vpop.f32.mrb[6].mxu1 }
 0x4a0   : > { %v3057_v19 = vpop.f32.mrb[7].mxu1  ;;  %v1372_v20 = vadd.f32 %v2882_v13, %v1365_v14 }
 0x4a2   : > { %v1532_v21 = vsel %vm1531_vm3, %v1372_v20, -inf }
 0x4a3   : > { %1533 = vmax.xlane.f32.xlu0 %v1532_v21 }
 0x50f   : > { %v1419_v22 = vpop.f32.mrb[8].mxu1 }
 0x510   : > { %v1425_v23 = vmul.f32 0.17677669, %v1419_v22  ;;  %v3062_v24 = vpop.f32.mrb[9].mxu1 }
 0x511   : > { %v1422_v25 = vpop.f32.mrb[10].mxu1 }
 0x512   : > { %v3063_v26 = vpop.f32.mrb[11].mxu1  ;;  %v1426_v27 = vadd.f32 %v2882_v13, %v1425_v23 }
 0x514   : > { %v1543_v28 = vsel %vm1531_vm3, %v1426_v27, -inf }
 0x515   : > { %1544 = vmax.xlane.f32.xlu1 %v1543_v28  ;;  %v3355_v28 = vld [vmem:[%s4421_s4 + $0x8] sm:$0xff]  }
 0x517   : > { %v1471_v29 = vpop.f32.mrb[12].mxu1 }
 0x518   : > { %v1477_v30 = vmul.f32 0.17677669, %v1471_v29  ;;  %v3068_v31 = vpop.f32.mrb[13].mxu1 }
 0x519   : > { %v1474_v32 = vpop.f32.mrb[14].mxu1 }
 0x51a   : > { %v3069_v33 = vpop.f32.mrb[15].mxu1  ;;  %v1478_v34 = vadd.f32 %v2882_v13, %v1477_v30  ;;  %v3356_v32 = vld [vmem:[%s4421_s4 + $0x10] sm:$0xff]  }
 0x51c   : > { %v1554_v35 = vsel %vm1531_vm3, %v1478_v34, -inf }
 0x51d   : > { %1555 = vmax.xlane.f32.xlu0 %v1554_v35  ;;  %v3359_v35 = vld [vmem:[%s4421_s4 + $0x28] sm:$0xff]  }
 0x51f   : > { %v1523_v36 = vpop.f32.mrb[16].mxu1 }
 0x520   : > { %v1529_v38 = vmul.f32 0.17677669, %v1523_v36  ;;  %v3074_v39 = vpop.f32.mrb[17].mxu1  ;;  %v3360_v36 = vld [vmem:[%s4421_s4 + $0x30] sm:$0xff]  }
 0x521   : > { %v1526_v40 = vpop.f32.mrb[18].mxu1 }
 0x522   : > { %v3075_v41 = vpop.f32.mrb[19].mxu1  ;;  %v1530_v42 = vadd.f32 %v2882_v13, %v1529_v38 }
 0x524   : > { %v1565_v45 = vsel %vm1531_vm3, %v1530_v42, -inf }
 0x525   : > { %1566 = vmax.xlane.f32.xlu0 %v1565_v45 }
 0x526   : > { %1626 = vrot.lane.b32.xlu1 %v4506_v1, %s3869_s8 }
 0x530   : > { %v1534_v47 = vpop.xlane.xlu0 %1533 }
 0x531   : > { %v1535_v48 = vsub.f32 %v1372_v20, %v1534_v47 }
 0x533   : > { %v1536_v49 = vmul.f32 1.442695, %v1535_v48 }
 0x535   : > { %3402 = vpow2.f32 %v1536_v49 }
 0x53f   : > { %v3403_v50 = vpop.eup %3402 }
 0x540   : > { %v1538_v51 = vsel %vm1531_vm3, %v3403_v50, 0.0 }
 0x54a   : > { %1539 = vadd.xlane.f32.xlu1 %v1538_v51 }
 0x5a2   : > { %v1545_v52 = vpop.xlane.xlu1 %1544 }
 0x5a3   : > { %v1546_v53 = vsub.f32 %v1426_v27, %v1545_v52  ;;  %v3354_v27 = vld [vmem:[%s4421_s4] sm:$0xff]  }
 0x5a5   : > { %v1547_v54 = vmul.f32 1.442695, %v1546_v53 }
 0x5a6   : > { %v1627_v55 = vpop.permute.xlu1 %1626 }
 0x5a7   : > { %3404 = vpow2.f32 %v1547_v54  ;;  %v1632_v56 = vsel %vm1580_vm2, %v1627_v55, 0 }
 0x5a8   : > { %3083 = vmatpush3.bf16.msra.mxu1 %v1632_v56 }
 0x5a9   : > { %3094 = vmatprep.subr.bf16.mxu1 %v3866_v17 }
 0x5aa   : > { %v1556_v57 = vpop.xlane.xlu0 %1555 }
 0x5ab   : > { %v1557_v58 = vsub.f32 %v1478_v34, %v1556_v57  ;;  %v3358_v34 = vld [vmem:[%s4421_s4 + $0x20] sm:$0xff]  }
 0x5ad   : > { %v1558_v59 = vmul.f32 1.442695, %v1557_v58 }
 0x5af   : > { %3406 = vpow2.f32 %v1558_v59 }
 0x5b1   : > { %v3405_v60 = vpop.eup %3404 }
 0x5b2   : > { %v1567_v61 = vpop.xlane.xlu0 %1566  ;;  %v1549_v62 = vsel %vm1531_vm3, %v3405_v60, 0.0 }
 0x5b3   : > { %v1568_v63 = vsub.f32 %v1530_v42, %v1567_v61  ;;  %1550 = vadd.xlane.f32.xlu0 %v1549_v62  ;;  %v3361_v42 = vld [vmem:[%s4421_s4 + $0x38] sm:$0xff]  }
 0x5b5   : > { %v1569_v0 = vmul.f32 1.442695, %v1568_v63 }
 0x5b7   : > { %3408 = vpow2.f32 %v1569_v0 }
 0x5b9   : > { %v3407_v2 = vpop.eup %3406 }
 0x5ba   : > { %v1560_v3 = vsel %vm1531_vm3, %v3407_v2, 0.0 }
 0x5bb   : > { %1561 = vadd.xlane.f32.xlu1 %v1560_v3 }
 0x5c1   : > { %v3409_v4 = vpop.eup %3408 }
 0x5c2   : > { %v1571_v5 = vsel %vm1531_vm3, %v3409_v4, 0.0 }
 0x5c3   : > { %1572 = vadd.xlane.f32.xlu0 %v1571_v5  ;;  %v3364_v5 = vld [vmem:[%s4377_s29 + $0x4] ss:$8 sps:$4 sm:$0xff]  }
 0x5cc   : > { %1724 = vrot.lane.b32.xlu1 %v4506_v1, %s3870_s15 }
 0x5d7   : > { %v1540_v6 = vpop.xlane.xlu1 %1539 }
 0x5d8   : > { %3410 = vrcp.f32 %v1540_v6  ;;  %v3367_v6 = vld [vmem:[%s4377_s29 + $0x14] ss:$8 sps:$4 sm:$0xff]  }
 0x5d9   : > { %1675 = vrot.lane.b32.xlu0 %v4506_v1, %s3868_s14 }
 0x5e2   : > { %v3411_v7 = vpop.eup %3410 }
 0x5e3   : > { %v1542_v8 = vmul.f32 %v3411_v7, %v3403_v50  ;;  %v3365_v7 = vld [vmem:[%s4377_s29 + $0x10] ss:$8 sps:$4 sm:$0xff]  }
 0x5e5   : > { %v1576_v9 = vpack.c.bf16 %v1542_v8, %v1542_v8  ;;  %v3370_v8 = vld [vmem:[%s4377_s29 + $0x24] ss:$8 sps:$4 sm:$0xff]  }
 0x5e7   : > { %3079 = vmatmul.mubr.msk.bf16.vlgmr.msra.gmra.mrb[4].mxu0 %vm1531_vm3, %v1576_v9  ;;  %v3368_v9 = vld [vmem:[%s4377_s29 + $0x20] ss:$8 sps:$4 sm:$0xff]  }
 0x5e8   : > { %3090 = vmatprep.mubr.msk.bf16.mxu0 %vm3867_vm0, %v3866_v17 }
 0x640   : > { %v1551_v10 = vpop.xlane.xlu0 %1550 }
 0x641   : > { %3412 = vrcp.f32 %v1551_v10 }
 0x648   : > { %v1562_v11 = vpop.xlane.xlu1 %1561 }
 0x649   : > { %3414 = vrcp.f32 %v1562_v11 }
 0x64b   : > { %v3413_v12 = vpop.eup %3412 }
 0x64c   : > { %v1553_v13 = vmul.f32 %v3413_v12, %v3405_v60  ;;  %v1725_v14 = vpop.permute.xlu1 %1724  ;;  %v2890_v60 = vld [vmem:[%s1007_s24] ss:$0 sm:$0xff]  ;;  %s4851_s24 = scalar_lea.vmem [#allocation8], %s4365_s2 }
 0x64d   : > { %v1730_v18 = vsel %vm1580_vm2, %v1725_v14, 0  ;;  %v3371_v14 = vld [vmem:[%s4377_s29 + $0x30] ss:$8 sps:$4 sm:$0xff]  }
 0x64e   : > { %v1624_v15 = vpack.c.bf16 %v1553_v13, %v1553_v13  ;;  %v3373_v13 = vld [vmem:[%s4377_s29 + $0x34] ss:$8 sps:$4 sm:$0xff]  }
 0x650   : > { %3085 = vmatmul.mubr.msk.bf16.vlgmr.msra.gmra.mrb[20].mxu1 %vm1531_vm3, %v1624_v15  ;;  %v1573_v1 = vpop.xlane.xlu0 %1572  ;;  %v3376_v15 = vld [vmem:[%s4377_s29 + $0x44] ss:$8 sps:$4 sm:$0xff]  }
 0x651   : > { %3095 = vmatpush3.bf16.msra.mxu1 %v1730_v18  ;;  %3416 = vrcp.f32 %v1573_v1  ;;  %3096 = vmatprep.mubr.msk.bf16.mxu1 %vm3867_vm0, %v3866_v17  ;;  %v3374_v18 = vld [vmem:[%s4377_s29 + $0x40] ss:$8 sps:$4 sm:$0xff]   ;;  %v3379_v1 = vld [vmem:[%s4377_s29 + $0x54] ss:$8 sps:$4 sm:$0xff]  }
 0x652   : > { %2039 = vmatprep.subr.bf16.mxu1 %v3364_v5 }
 0x653   : > { %v3415_v19 = vpop.eup %3414 }
 0x654   : > { %v1564_v20 = vmul.f32 %v3415_v19, %v3407_v2  ;;  %v1676_v21 = vpop.permute.xlu0 %1675  ;;  %v3377_v19 = vld [vmem:[%s4377_s29 + $0x50] ss:$8 sps:$4 sm:$0xff]  }
 0x655   : > { %v1681_v22 = vsel %vm1580_vm2, %v1676_v21, 0  ;;  %v3380_v21 = vld [vmem:[%s4377_s29 + $0x60] ss:$8 sps:$4 sm:$0xff]  }
 0x656   : > { %3089 = vmatpush3.bf16.msra.mxu0 %v1681_v22  ;;  %v1674_v23 = vpack.c.bf16 %v1564_v20, %v1564_v20  ;;  %v3382_v20 = vld [vmem:[%s4377_s29 + $0x64] ss:$8 sps:$4 sm:$0xff]   ;;  %v3385_v22 = vld [vmem:[%s4377_s29 + $0x74] ss:$8 sps:$4 sm:$0xff]  }
 0x657   : > { %3100 = vmatprep.subr.bf16.mxu0 %v3866_v17 }
 0x659   : > { %3091 = vmatmul.mubr.msk.bf16.vlgmr.msra.gmra.mrb[8].mxu0 %vm1531_vm3, %v1674_v23  ;;  %v3383_v23 = vld [vmem:[%s4377_s29 + $0x70] ss:$8 sps:$4 sm:$0xff]  }
 0x65a   : > { %3116 = vmatprep.mubr.msk.bf16.mxu0 %vm3867_vm0, %v3866_v17  ;;  %3101 = vmatpush3.bf16.msra.mxu0 %v3354_v27 }
 0x65b   : > { %v3417_v24 = vpop.eup %3416  ;;  %3102 = vmatprep.subr.bf16.mxu0 %v3866_v17 }
 0x65c   : > { %v1575_v25 = vmul.f32 %v3417_v24, %v3409_v4  ;;  %v3362_v4 = vld [vmem:[%s4377_s29] ss:$8 sps:$4 sm:$0xff]  }
 0x65e   : > { %v1723_v26 = vpack.c.bf16 %v1575_v25, %v1575_v25  ;;  %3103 = vmatpush3.bf16.msra.mxu0 %v3355_v28  ;;  %v2899_v28 = vld [vmem:[%s4851_s24] ss:$0 sm:$0xff] }
 0x65f   : > { %3104 = vmatprep.subr.bf16.mxu0 %v3866_v17 }
 0x660   : > { %3097 = vmatmul.mubr.msk.bf16.vlgmr.msra.gmra.mrb[24].mxu1 %vm1531_vm3, %v1723_v26 }
 0x661   : > { %2071 = vmatprep.mubr.bf16.mxu1 %v3865_v16  ;;  %v3357_v16 = vld [vmem:[%s4421_s4 + $0x18] sm:$0xff]   ;;  %2040 = vmatpush1.bf16.msra.mxu1 %v3362_v4 }
 0x662   : > { %3105 = vmatpush3.bf16.msra.mxu0 %v3356_v32  ;;  %2041 = vmatprep.subr.bf16.mxu1 %v3367_v6 }
 0x663   : > { %3106 = vmatprep.subr.bf16.mxu0 %v3866_v17 }
 0x665   : > { %2042 = vmatpush1.bf16.msra.mxu1 %v3365_v7 }
 0x666   : > { %3107 = vmatpush3.bf16.msra.mxu0 %v3357_v16  ;;  %2043 = vmatprep.subr.bf16.mxu1 %v3370_v8  ;;  %v3386_v16 = vld [vmem:[%s4379_s20 + $0x40] sm:$0xff]  }
 0x667   : > { %3108 = vmatprep.subr.bf16.mxu0 %v3866_v17 }
 0x669   : > { %2044 = vmatpush1.bf16.msra.mxu1 %v3368_v9 }
 0x66a   : > { %3109 = vmatpush3.bf16.msra.mxu0 %v3358_v34  ;;  %2045 = vmatprep.subr.bf16.mxu1 %v3373_v13  ;;  %v3387_v34 = vld [vmem:[%s4379_s20] sm:$0xff]  }
 0x66b   : > { %3110 = vmatprep.subr.bf16.mxu0 %v3866_v17 }
 0x66d   : > { %2046 = vmatpush1.bf16.msra.mxu1 %v3371_v14 }
 0x66e   : > { %3111 = vmatpush3.bf16.msra.mxu0 %v3359_v35  ;;  %2047 = vmatprep.subr.bf16.mxu1 %v3376_v15  ;;  %v3388_v35 = vld [vmem:[%s4379_s20 + $0x48] sm:$0xff]  }
 0x66f   : > { %3112 = vmatprep.subr.bf16.mxu0 %v3866_v17 }
 0x671   : > { %2048 = vmatpush1.bf16.msra.mxu1 %v3374_v18  ;;  %v2917_v18 = vld [vmem:[%s1014_s27] ss:$0 sm:$0xff] }
 0x672   : > { %3113 = vmatpush3.bf16.msra.mxu0 %v3360_v36  ;;  %2049 = vmatprep.subr.bf16.mxu1 %v3379_v1  ;;  %v3389_v36 = vld [vmem:[%s4379_s20 + $0x8] sm:$0xff]  }
 0x673   : > { %3114 = vmatprep.subr.bf16.mxu0 %v3866_v17 }
 0x675   : > { %2050 = vmatpush1.bf16.msra.mxu1 %v3377_v19 }
 0x676   : > { %3115 = vmatpush3.bf16.msra.mxu0 %v3361_v42  ;;  %2051 = vmatprep.subr.bf16.mxu1 %v3382_v20  ;;  %v3394_v42 = vld [vmem:[%s4379_s20 + $0x60] sm:$0xff]  }
 0x677   : > { %2992 = vmatprep.subr.bf16.mxu0 %v3386_v16 }
 0x679   : > { %2052 = vmatpush1.bf16.msra.mxu1 %v3380_v21 }
 0x67a   : > { %2053 = vmatprep.subr.bf16.mxu1 %v3385_v22 }
 0x67d   : > { %2054 = vmatpush1.bf16.msra.mxu1 %v3383_v23 }
 0x6ba   : > { %v1618_v29 = vpop.f32.mrb[4].mxu0 }
 0x6bb   : > { %v3080_v30 = vpop.f32.mrb[5].mxu0 }
 0x6bc   : > { %v1621_v31 = vpop.f32.mrb[6].mxu0  ;;  %v2900_v30 = vld [vmem:[%s4852_s9] ss:$0 sm:$0xff] }
 0x6bd   : > { %v3081_v33 = vpop.f32.mrb[7].mxu0 }
 0x723   : > { %v1668_v38 = vpop.f32.mrb[20].mxu1 }
 0x724   : > { %1773 = vrot.lane.b32.xlu1 %v1668_v38, %s3870_s15  ;;  %v3086_v39 = vpop.f32.mrb[21].mxu1  ;;  %v3390_v38 = vld [vmem:[%s4379_s20 + $0x50] sm:$0xff]  }
 0x725   : > { %v1671_v40 = vpop.f32.mrb[22].mxu1  ;;  %v3391_v39 = vld [vmem:[%s4379_s20 + $0x10] sm:$0xff]  }
 0x726   : > { %v3087_v41 = vpop.f32.mrb[23].mxu1  ;;  %v3392_v40 = vld [vmem:[%s4379_s20 + $0x58] sm:$0xff]  }
 0x727   : > { %v3393_v41 = vld [vmem:[%s4379_s20 + $0x18] sm:$0xff]  }
 0x72c   : > { %v1717_v45 = vpop.f32.mrb[8].mxu0 }
 0x72d   : > { %1777 = vrot.lane.b32.xlu0 %v1717_v45, %s3868_s14  ;;  %v3092_v47 = vpop.f32.mrb[9].mxu0  ;;  %v3395_v45 = vld [vmem:[%s4379_s20 + $0x20] sm:$0xff]  }
 0x72e   : > { %v1720_v48 = vpop.f32.mrb[10].mxu0  ;;  %v3396_v47 = vld [vmem:[%s4379_s20 + $0x68] sm:$0xff]  }
 0x72f   : > { %v3093_v49 = vpop.f32.mrb[11].mxu0  ;;  %v3397_v48 = vld [vmem:[%s4379_s20 + $0x28] sm:$0xff]  }
 0x730   : > { %v3398_v49 = vld [vmem:[%s4379_s20 + $0x70] sm:$0xff]  }
 0x733   : > { %v1766_v50 = vpop.f32.mrb[24].mxu1 }
 0x734   : > { %1781 = vrot.lane.b32.xlu1 %v1766_v50, %s3869_s8  ;;  %v3098_v51 = vpop.f32.mrb[25].mxu1  ;;  %v3399_v50 = vld [vmem:[%s4379_s20 + $0x30] sm:$0xff]  }
 0x735   : > { %v1769_v52 = vpop.f32.mrb[26].mxu1  ;;  %v3400_v51 = vld [vmem:[%s4379_s20 + $0x78] sm:$0xff]  }
 0x736   : > { %v3099_v53 = vpop.f32.mrb[27].mxu1  ;;  %v3401_v52 = vld [vmem:[%s4379_s20 + $0x38] sm:$0xff]  }
 0x737   : > { %v1947_v53 = vld [vmem:[%s4431_s30] sm:$0x3] }
 0x796   : > { %v1774_v54 = vpop.permute.xlu1 %1773 }
 0x797   : > { %v1784_v17 = vsel %vm1318_vm1, %v1618_v29, %v1774_v54  ;;  %v1952_v54 = vrot.slane %v1947_v53, %v4489_v46 }
 0x79f   : > { %v1778_v55 = vpop.permute.xlu0 %1777 }
 0x7a0   : > { %v1786_v56 = vsel %vm1785_vm4, %v1784_v17, %v1778_v55  ;;  %v1956_v55 = vrot.slane %v1947_v53, %v1097_v44  ;;  %v3433_v53 = vld [vmem:[%s4857_s18 + $0x38] sm:$0xff] (!%p2936_p9)  }
 0x7a6   : > { %v1782_v57 = vpop.permute.xlu1 %1781 }
 0x7a7   : > { %v1788_v58 = vsel %vm1787_vm5, %v1786_v56, %v1782_v57 }
 0x7a8   : > { %v1789_v59 = vpack.c.bf16 %v1788_v58, %v1788_v58 }
 0x7aa   : > { %3117 = vmatmul.mubr.bf16.vlgmr.msra.gmra.mrb[12].mxu0 %v1789_v59 }
 0x7ab   : > { %2993 = vmatpush3.bf16.msra.mxu0 %v3387_v34  ;;  %v2935_v34 = vld [vmem:[%s4855_s5] ss:$0 sm:$0xff] }
 0x7ac   : > { %2994 = vmatprep.subr.bf16.mxu0 %v3388_v35 }
 0x7af   : > { %2995 = vmatpush3.bf16.msra.mxu0 %v3389_v36 }
 0x7b0   : > { %2996 = vmatprep.subr.bf16.mxu0 %v3390_v38  ;;  %v3871_v38 = vmov (!%p2936_p9), 0.0  }
 0x7b1   : > { %3140 = vmatprep.subr.bf16.mxu1 (!%p2936_p9), %v3871_v38 }
 0x7b3   : > { %2997 = vmatpush3.bf16.msra.mxu0 %v3391_v39  ;;  %v3427_v39 = vld [vmem:[%s4857_s18 + $0x8] sm:$0xff] (!%p2936_p9)  }
 0x7b4   : > { %2998 = vmatprep.subr.bf16.mxu0 %v3392_v40  ;;  %v3428_v40 = vld [vmem:[%s4857_s18 + $0x10] sm:$0xff] (!%p2936_p9)  }
 0x7b7   : > { %2999 = vmatpush3.bf16.msra.mxu0 %v3393_v41  ;;  %v3434_v41 = vld [vmem:[%s4858_s23] sm:$0xff] (!%p2936_p9)  }
 0x7b8   : > { %3000 = vmatprep.subr.bf16.mxu0 %v3394_v42  ;;  %v3429_v42 = vld [vmem:[%s4857_s18 + $0x18] sm:$0xff] (!%p2936_p9)  }
 0x7bb   : > { %3001 = vmatpush3.bf16.msra.mxu0 %v3395_v45  ;;  %v3435_v45 = vld [vmem:[%s4859_s16 + $0x8] sm:$0xff] (!%p2936_p9)  }
 0x7bc   : > { %3002 = vmatprep.subr.bf16.mxu0 %v3396_v47  ;;  %v3430_v47 = vld [vmem:[%s4857_s18 + $0x20] sm:$0xff] (!%p2936_p9)  }
 0x7bf   : > { %3003 = vmatpush3.bf16.msra.mxu0 %v3397_v48  ;;  %v3436_v48 = vld [vmem:[%s4859_s16 + $0x10] sm:$0xff] (!%p2936_p9)  }
 0x7c0   : > { %3004 = vmatprep.subr.bf16.mxu0 %v3398_v49  ;;  %v3431_v49 = vld [vmem:[%s4857_s18 + $0x28] sm:$0xff] (!%p2936_p9)  }
 0x7c3   : > { %3005 = vmatpush3.bf16.msra.mxu0 %v3399_v50  ;;  %v3437_v50 = vld [vmem:[%s4859_s16 + $0x18] sm:$0xff] (!%p2936_p9)  }
 0x7c4   : > { %3006 = vmatprep.subr.bf16.mxu0 %v3400_v51  ;;  %v3432_v51 = vld [vmem:[%s4857_s18 + $0x30] sm:$0xff] (!%p2936_p9)  }
 0x7c7   : > { %3007 = vmatpush3.bf16.msra.mxu0 %v3401_v52  ;;  %v3438_v52 = vld [vmem:[%s4859_s16 + $0x20] sm:$0xff] (!%p2936_p9)  }
 0x7c8   : > { %3120 = vmatprep.subr.bf16.mxu0 (!%p2936_p9), %v3871_v38 }
 0x87d   : > { %v1895_v61 = vpop.f32.mrb[12].mxu0 }
 0x87e   : > { %v1896_v62 = vadd.f32 %v2890_v60, %v1895_v61  ;;  %v3118_v63 = vpop.f32.mrb[13].mxu0 }
 0x87f   : > { %v1898_v0 = vpop.f32.mrb[14].mxu0 }
 0x880   : > { %v3119_v2 = vpop.f32.mrb[15].mxu0  ;;  %v1901_v3 = vadd.f32 %v1896_v62, %v4465_v37 }
 0x882   : > { %1904 = vadd.xlane.f32.xlu0 %v1901_v3 }
 0x90f   : > { %v1905_v37 = vpop.xlane.xlu0 %1904 }
 0x910   : > { %v1907_v10 = vmul.f32 0.0078125, %v1905_v37 }
 0x912   : > { %v1908_v11 = vsub.f32 %v1901_v3, %v1907_v10 }
 0x914   : > { %v1909_v12 = vmul.f32 %v1908_v11, %v1908_v11 }
 0x916   : > { %1910 = vadd.xlane.f32.xlu1 %v1909_v12 }
 0x9a3   : > { %v1911_v24 = vpop.xlane.xlu1 %1910 }
 0x9a4   : > { %v1912_v25 = vmul.f32 0.0078125, %v1911_v24 }
 0x9a6   : > { %v1913_v26 = vadd.f32 1e-12, %v1912_v25 }
 0x9a8   : > { %3418 = vrsqrt.f32 %v1913_v26 }
 0x9b2   : > { %v3419_v27 = vpop.eup %3418 }
 0x9b3   : > { %v1915_v29 = vmul.f32 %v3419_v27, %v1908_v11 }
 0x9b5   : > { %v1922_v31 = vmul.f32 %v2899_v28, %v1915_v29 }
 0x9b7   : > { %v4606_v32 = vadd.f32 %v2900_v30, %v1922_v31 }
 0x9b9   : > { %v1930_v33 = vpack.c.bf16 %v4606_v32, %v4606_v32 }
 0x9bb   : > { %2072 = vmatmul.mubr.bf16.vlgmr.msra.gmra.mrb[28].mxu1 %v1930_v33  ;;  %v2934_v33 = vld [vmem:[%s4854_s10] ss:$0 sm:$0xff] }
 0x9bc   : > { %3156 = vmatprep.mubr.msk.bf16.mxu1 (!%p2936_p9), %vm3872_vm6, %v3871_v38  ;;  %3141 = vmatpush3.bf16.msra.mxu1 (!%p2936_p9), %v3434_v41 }
 0x9bd   : > { %3142 = vmatprep.subr.bf16.mxu1 (!%p2936_p9), %v3871_v38 }
 0x9c0   : > { %3143 = vmatpush3.bf16.msra.mxu1 (!%p2936_p9), %v3435_v45 }
 0x9c1   : > { %3144 = vmatprep.subr.bf16.mxu1 (!%p2936_p9), %v3871_v38 }
 0x9c4   : > { %3145 = vmatpush3.bf16.msra.mxu1 (!%p2936_p9), %v3436_v48 }
 0x9c5   : > { %3146 = vmatprep.subr.bf16.mxu1 (!%p2936_p9), %v3871_v38 }
 0x9c8   : > { %3147 = vmatpush3.bf16.msra.mxu1 (!%p2936_p9), %v3437_v50 }
 0x9c9   : > { %3148 = vmatprep.subr.bf16.mxu1 (!%p2936_p9), %v3871_v38 }
 0x9cc   : > { %3149 = vmatpush3.bf16.msra.mxu1 (!%p2936_p9), %v3438_v52 }
 0x9cd   : > { %3150 = vmatprep.subr.bf16.mxu1 (!%p2936_p9), %v3871_v38 }
 0xa8e   : > { %v2073_v17 = vpop.f32.mrb[28].mxu1 }
 0xa8f   : > { %v2074_v56 = vadd.f32 %v2073_v17, %v1952_v54  ;;  %v2075_v57 = vpop.f32.mrb[29].mxu1  ;;  %v3439_v54 = vld [vmem:[%s4859_s16 + $0x28] sm:$0xff] (!%p2936_p9)   ;;  %v3440_v17 = vld [vmem:[%s4859_s16 + $0x30] sm:$0xff] (!%p2936_p9)  }
 0xa90   : > { %v2076_v58 = vadd.f32 %v2075_v57, %v1956_v55  ;;  %v2077_v59 = vpop.f32.mrb[30].mxu1  ;;  %3151 = vmatpush3.bf16.msra.mxu1 (!%p2936_p9), %v3439_v54  ;;  %v2325_v57 = vld [vmem:[#allocation14] sm:$0x1] (!%p2936_p9) }
 0xa91   : > { %v2082_v60 = vmul.f32 0.044715, %v2074_v56  ;;  %v2078_v61 = vpop.f32.mrb[31].mxu1  ;;  %v2080_v8 = vmul.f32 0.5, %v2074_v56  ;;  %3152 = vmatprep.subr.bf16.mxu1 (!%p2936_p9), %v3871_v38 }
 0xa92   : > { %v2083_v62 = vmul.f32 0.044715, %v2076_v58  ;;  %v2081_v37 = vmul.f32 0.5, %v2076_v58 }
 0xa93   : > { %v2084_v63 = vmul.f32 %v2082_v60, %v2074_v56 }
 0xa94   : > { %v2085_v0 = vmul.f32 %v2083_v62, %v2076_v58  ;;  %3153 = vmatpush3.bf16.msra.mxu1 (!%p2936_p9), %v3440_v17 }
 0xa95   : > { %v2086_v2 = vmul.f32 %v2084_v63, %v2074_v56  ;;  %3154 = vmatprep.subr.bf16.mxu1 (!%p2936_p9), %v3871_v38 }
 0xa96   : > { %v2087_v3 = vmul.f32 %v2085_v0, %v2076_v58 }
 0xa97   : > { %v2088_v4 = vadd.f32 %v2086_v2, %v2074_v56  ;;  %v3441_v56 = vld [vmem:[%s4859_s16 + $0x38] sm:$0xff] (!%p2936_p9)   ;;  %v2432_v2 = vld [vmem:[#allocation15] sm:$0x1] (!%p2936_p9) }
 0xa98   : > { %v2089_v5 = vadd.f32 %v2087_v3, %v2076_v58  ;;  %3155 = vmatpush3.bf16.msra.mxu1 (!%p2936_p9), %v3441_v56 }
 0xa99   : > { %v2090_v6 = vmul.f32 0.7978846, %v2088_v4 }
 0xa9a   : > { %v2091_v7 = vmul.f32 0.7978846, %v2089_v5 }
 0xa9b   : > { %3420 = vtanh.f32 %v2090_v6 }
 0xa9c   : > { %3422 = vtanh.f32 %v2091_v7 }
 0xaa5   : > { %v3421_v43 = vpop.eup %3420 }
 0xaa6   : > { %v3423_v44 = vpop.eup %3422  ;;  %v2094_v9 = vadd.f32 1.0, %v3421_v43 }
 0xaa7   : > { %v2095_v10 = vadd.f32 1.0, %v3423_v44 }
 0xaa8   : > { %v2096_v11 = vmul.f32 %v2094_v9, %v2080_v8 }
 0xaa9   : > { %v2097_v12 = vmul.f32 %v2095_v10, %v2081_v37 }
 0xaaa   : > { %v2098_v14 = vpack.c.bf16 %v2096_v11, %v2096_v11 }
 0xaab   : > { %v2099_v13 = vpack.c.bf16 %v2097_v12, %v2097_v12 }
 0xaad   : > { %2267 = vmatprep.mubr.bf16.mxu0 %v2099_v13 }
 0xaae   : > { %2268 = vmatmul.mubr.bf16.vlgmr.msra.gmra.mrb[16].mxu0 %v2098_v14 }
 0xaaf   : > { %3136 = vmatprep.mubr.msk.bf16.mxu0 (!%p2936_p9), %vm3872_vm6, %v3871_v38 }
 0xb81   : > { %v3008_v15 = vpop.f32.mrb[16].mxu0 }
 0xb82   : > { %v3009_v1 = vpop.f32.mrb[17].mxu0 }
 0xb83   : > { %v3010_v19 = vadd.f32 %v3009_v1, %v3008_v15  ;;  %v3011_v20 = vpop.f32.mrb[18].mxu0 }
 0xb84   : > { %v3012_v21 = vpop.f32.mrb[19].mxu0 }
 0xb85   : > { %v2270_v22 = vadd.f32 %v3010_v19, %v2917_v18 }
 0xb87   : > { %v2275_v23 = vadd.f32 %v2270_v22, %v4606_v32  ;;  %v3426_v32 = vld [vmem:[%s4857_s18] sm:$0xff] (!%p2936_p9)  }
 0xb88   : > { %3121 = vmatpush3.bf16.msra.mxu0 (!%p2936_p9), %v3426_v32 }
 0xb89   : > { %2278 = vadd.xlane.f32.xlu0 %v2275_v23  ;;  %3122 = vmatprep.subr.bf16.mxu0 (!%p2936_p9), %v3871_v38 }
 0xb8c   : > { %3123 = vmatpush3.bf16.msra.mxu0 (!%p2936_p9), %v3427_v39 }
 0xb8d   : > { %3124 = vmatprep.subr.bf16.mxu0 (!%p2936_p9), %v3871_v38 }
 0xb90   : > { %3125 = vmatpush3.bf16.msra.mxu0 (!%p2936_p9), %v3428_v40 }
 0xb91   : > { %3126 = vmatprep.subr.bf16.mxu0 (!%p2936_p9), %v3871_v38 }
 0xb94   : > { %3127 = vmatpush3.bf16.msra.mxu0 (!%p2936_p9), %v3429_v42 }
 0xb95   : > { %3128 = vmatprep.subr.bf16.mxu0 (!%p2936_p9), %v3871_v38 }
 0xb98   : > { %3129 = vmatpush3.bf16.msra.mxu0 (!%p2936_p9), %v3430_v47 }
 0xb99   : > { %3130 = vmatprep.subr.bf16.mxu0 (!%p2936_p9), %v3871_v38 }
 0xb9c   : > { %3131 = vmatpush3.bf16.msra.mxu0 (!%p2936_p9), %v3431_v49 }
 0xb9d   : > { %3132 = vmatprep.subr.bf16.mxu0 (!%p2936_p9), %v3871_v38 }
 0xba0   : > { %3133 = vmatpush3.bf16.msra.mxu0 (!%p2936_p9), %v3432_v51 }
 0xba1   : > { %3134 = vmatprep.subr.bf16.mxu0 (!%p2936_p9), %v3871_v38 }
 0xba4   : > { %3135 = vmatpush3.bf16.msra.mxu0 (!%p2936_p9), %v3433_v53 }
 0xc16   : > { %v2279_v24 = vpop.xlane.xlu0 %2278 }
 0xc17   : > { %v2280_v25 = vmul.f32 0.0078125, %v2279_v24 }
 0xc19   : > { %v2281_v26 = vsub.f32 %v2275_v23, %v2280_v25 }
 0xc1b   : > { %v2282_v27 = vmul.f32 %v2281_v26, %v2281_v26 }
 0xc1d   : > { %2283 = vadd.xlane.f32.xlu0 %v2282_v27 }
 0xcaa   : > { %v2284_v28 = vpop.xlane.xlu0 %2283 }
 0xcab   : > { %v2285_v29 = vmul.f32 0.0078125, %v2284_v28 }
 0xcad   : > { %v2286_v30 = vadd.f32 1e-12, %v2285_v29 }
 0xcaf   : > { %3424 = vrsqrt.f32 %v2286_v30 }
 0xcb9   : > { %v3425_v31 = vpop.eup %3424 }
 0xcba   : > { %v2288_v16 = vmul.f32 %v3425_v31, %v2281_v26  ;;  %2307 = sbr.rel (%p2936_p9) target bundleno = 3701 (0xe75), region = 152 }
 0xcbc   : > { %v2295_v35 = vmul.f32 %v2934_v33, %v2288_v16 }
 0xcbe   : > { %v2302_v36 = vadd.f32 %v2935_v34, %v2295_v35 }
 0xcc0   : > { %2303 = vst [vmem:[#allocation2] sm:$0xff] %v2302_v36  ;;  %v2308_v55 = vpack.c.bf16 (!%p2936_p9), %v2302_v36, %v2302_v36 }
 0xcc2   : > { %3137 = vmatmul.mubr.bf16.vlgmr.msra.gmra.mrb[0].mxu0 %v2308_v55 }
 0xd95   : > { %v2408_v58 = vpop.f32.mrb[0].mxu0 }
 0xd96   : > { %v2409_v59 = vadd.f32 %v2408_v58, %v2325_v57  ;;  %v3138_v60 = vpop.f32.mrb[1].mxu0 }
 0xd97   : > { %v2411_v61 = vpop.f32.mrb[2].mxu0 }
 0xd98   : > { %v2414_v62 = vmax.f32 %v2409_v59, 0.0  ;;  %v3139_v63 = vpop.f32.mrb[3].mxu0 }
 0xd9a   : > { %v2415_v0 = vpack.c.bf16 %v2414_v62, %v2414_v62 }
 0xd9c   : > { %3157 = vmatmul.mubr.bf16.vlgmr.msra.gmra.mrb[0].mxu1 %v2415_v0 }
 0xe6f   : > { %v2515_v3 = vpop.f32.mrb[0].mxu1 }
 0xe70   : > { %v2516_v4 = vadd.f32 %v2515_v3, %v2432_v2  ;;  %v3158_v5 = vpop.f32.mrb[1].mxu1 }
 0xe71   : > { %v2518_v6 = vpop.f32.mrb[2].mxu1 }
 0xe72   : > { %v2524_v7 = vrot.slane %v2516_v4, %v4489_v46  ;;  %v3159_v43 = vpop.f32.mrb[3].mxu1 }
 0xe74   : > { %2525 = vst [vmem:[%s4436_s7] sm:$0xff] %v2524_v7 }
 0xe75 PF: > { %s4860_s21 = sld [smem:[#allocation28_spill]]  ;;  %s4861_s1 = sld [smem:[#allocation22_spill]] }
 0xe76   : > { %s4862_s22 = sld [smem:[#allocation23_spill]]  ;;  %s4863_s23 = sld [smem:[#allocation32_spill]] }
 0xe77   : > { %s4864_s24 = sld [smem:[#allocation26_spill]]  ;;  %s4865_s2 = sld [smem:[#allocation27_spill]] }
 0xe78   : > { %s4866_s25 = sld [smem:[#allocation30_spill]]  ;;  %s4867_s3 = sld [smem:[#allocation31_spill]] }
 0xe7b   : > { %s33_s26 = sadd.s32 1, %s4860_s21  }
 0xe7c   : > { %p30_p4 = scmp.ge.s32.totalorder %s33_s26, 6  }
 0xe7e   :  { %32 = sbr.rel (!%p30_p4) target bundleno = 28 (0x1c), region = 250 }
 0xe85   :  { %2545 = vsyncpa [#allocation4], 1 }
 0xe86   :  { %2547 = vsyncpa [#allocation4 + $0x1], 1 }
 0xe87   :  { %2548 = vsyncpa [#allocation6], 1 }
 0xe88   :  { %2549 = vsyncpa [#allocation16], 1 }

</bundles_post_ra>
